<compile_context>
chip_gen: v6e
topology: v6e:2x2x1
jax: 0.10.0
libtpu: 0.0.40
codegen_flags: <defaults>
</compile_context>

<pallas_src>
import jax
import jax.numpy as jnp
from jax.experimental import pallas as pl
from jax.experimental.pallas import tpu as pltpu

HIDDEN = 2048  # fixed by nn.Linear(dim, 2048)


# ----------------------------------------------------------------------------
# Resident-weights path: whole W1 / W2 live in VMEM, one grid step per batch
# tile does the entire forward (no reduction axis, no accumulator scratch).
# ----------------------------------------------------------------------------
def hdcnn_resident_kernel(x_ref, w1_ref, b1_ref, w2_ref, b2_ref, o_ref):
    x = x_ref[...].astype(jnp.bfloat16)                            # cast on VPU
    h = jnp.dot(x, w1_ref[...], preferred_element_type=jnp.float32)
    h = jnp.maximum(h + b1_ref[...], 0.0)                          # fc1 + ReLU
    # dropout: identity (eval mode)
    out = jnp.dot(h.astype(jnp.bfloat16), w2_ref[...],
                  preferred_element_type=jnp.float32) + b2_ref[...]  # fc2
    sq = jnp.sum(out * out, axis=1, keepdims=True)                  # (tb, 1)
    inv = jnp.where(sq == 0.0, jnp.ones_like(sq), jax.lax.rsqrt(sq))
    o_ref[...] = (out * inv).astype(o_ref.dtype)


# ----------------------------------------------------------------------------
# Streamed-weights fallback (large D): HIDDEN axis streams W1 col-tiles and
# W2 row-tiles; f32 accumulator in VMEM scratch, init/finalize via pl.when.
# ----------------------------------------------------------------------------
def hdcnn_streamed_kernel(x_ref, w1_ref, b1_ref, w2_ref, b2_ref, o_ref, acc_ref):
    k = pl.program_id(1)

    @pl.when(k == 0)
    def _():
        acc_ref[...] = jnp.zeros_like(acc_ref)

    x = x_ref[...].astype(jnp.bfloat16)
    h = jnp.dot(x, w1_ref[...], preferred_element_type=jnp.float32)
    h = jnp.maximum(h + b1_ref[...], 0.0)
    # dropout: identity (eval mode)
    acc_ref[...] += jnp.dot(h.astype(jnp.bfloat16), w2_ref[...],
                            preferred_element_type=jnp.float32)

    @pl.when(k == pl.num_programs(1) - 1)
    def _():
        out = acc_ref[...] + b2_ref[...]
        sq = jnp.sum(out * out, axis=1, keepdims=True)
        inv = jnp.where(sq == 0.0, jnp.ones_like(sq), jax.lax.rsqrt(sq))
        o_ref[...] = (out * inv).astype(o_ref.dtype)


def hdcnn_forward(x, w1, b1, w2, b2, *, tile_b=256,
                  vmem_budget_bytes=24 * 1024 * 1024):
    B, D = x.shape
    assert D % 128 == 0, "D must be a multiple of 128 (lane-dense output)"
    assert w1.shape == (D, HIDDEN)
    assert w2.shape == (HIDDEN, D)

    b1 = jnp.reshape(b1, (1, HIDDEN)).astype(jnp.float32)
    b2 = jnp.reshape(b2, (1, D)).astype(jnp.float32)

    # Batch tile: use the full batch when small; 256 fills the v6e/v7x MXU
    # once the batch is large enough to split.
    tb = B if B <= tile_b else tile_b
    assert B % tb == 0, "B must be a multiple of tile_b (or B <= tile_b)"
    assert tb == B or tb % 8 == 0
    n_btiles = B // tb

    # Weights streamed as bf16 (halves HBM bytes; native MXU path), f32 accum.
    w1_bf = w1.astype(jnp.bfloat16)
    w2_bf = w2.astype(jnp.bfloat16)

    # ---- VMEM budget: can both full weight matrices stay resident? --------
    w_bytes = 2 * D * HIDDEN * 2                     # W1 + W2, bf16
    act_bytes = 2 * tb * (2 * D * 4 + HIDDEN * 4)    # x/out tiles + h temp
    resident = (2 * w_bytes + act_bytes) <= vmem_budget_bytes

    flops = 4 * B * HIDDEN * D                       # two matmuls, 2*B*H*D each

    if resident:
        cost = pl.CostEstimate(
            flops=flops,
            transcendentals=B,
            bytes_accessed=(B * D * 4            # x read (f32)
                            + w_bytes            # weights read once
                            + HIDDEN * 4 + D * 4  # biases
                            + B * D * 4),        # output write
        )
        return pl.pallas_call(
            hdcnn_resident_kernel,
            out_shape=jax.ShapeDtypeStruct((B, D), jnp.float32),
            grid_spec=pltpu.PrefetchScalarGridSpec(
                num_scalar_prefetch=0,
                grid=(n_btiles,),
                in_specs=[
                    pl.BlockSpec((tb, D), lambda b: (b, 0)),        # x
                    pl.BlockSpec((D, HIDDEN), lambda b: (0, 0)),    # W1 (resident)
                    pl.BlockSpec((1, HIDDEN), lambda b: (0, 0)),    # b1
                    pl.BlockSpec((HIDDEN, D), lambda b: (0, 0)),    # W2 (resident)
                    pl.BlockSpec((1, D), lambda b: (0, 0)),         # b2
                ],
                out_specs=pl.BlockSpec((tb, D), lambda b: (b, 0)),
            ),
            compiler_params=pltpu.CompilerParams(
                dimension_semantics=("parallel",),
            ),
            cost_estimate=cost,
        )(x, w1_bf, b1, w2_bf, b2)

    # ---- Streamed fallback for very large D --------------------------------
    # TODO(synk): small-batch v7x case leaves one TensorCore idle; a cross-core
    # HIDDEN split (core_map + CMEM combine) would recover it.
    # Largest HIDDEN tile (divisor of 2048, multiple of 128) fitting the budget
    # with double-buffered W1-col + W2-row tiles.
    tile_h = 128
    for cand in (2048, 1024, 512, 256, 128):
        per_step = 2 * 2 * (D * cand * 2 + cand * D * 2)   # 2 bufs, bf16
        if HIDDEN % cand == 0 and per_step + act_bytes <= vmem_budget_bytes:
            tile_h = cand
            break

    cost = pl.CostEstimate(
        flops=flops,
        transcendentals=B,
        bytes_accessed=(B * D * 4
                        + n_btiles * w_bytes      # weights re-streamed per batch tile
                        + HIDDEN * 4 + D * 4
                        + B * D * 4),
    )
    return pl.pallas_call(
        hdcnn_streamed_kernel,
        out_shape=jax.ShapeDtypeStruct((B, D), jnp.float32),
        grid_spec=pltpu.PrefetchScalarGridSpec(
            num_scalar_prefetch=0,
            grid=(n_btiles, HIDDEN // tile_h),
            in_specs=[
                pl.BlockSpec((tb, D), lambda b, k: (b, 0)),         # x
                pl.BlockSpec((D, tile_h), lambda b, k: (0, k)),     # W1 col-tile
                pl.BlockSpec((1, tile_h), lambda b, k: (0, k)),     # b1 tile
                pl.BlockSpec((tile_h, D), lambda b, k: (k, 0)),     # W2 row-tile
                pl.BlockSpec((1, D), lambda b, k: (0, 0)),          # b2
            ],
            out_specs=pl.BlockSpec((tb, D), lambda b, k: (b, 0)),
            scratch_shapes=[pltpu.VMEM((tb, D), jnp.float32)],
        ),
        compiler_params=pltpu.CompilerParams(
            dimension_semantics=("parallel", "arbitrary"),
        ),
        cost_estimate=cost,
    )(x, w1_bf, b1, w2_bf, b2)


def reference_forward(x, w1, b1, w2, b2):
    # Mirrors the kernel's bf16-weight / f32-accumulate numerics.
    x_bf = x.astype(jnp.bfloat16)
    w1_bf = w1.astype(jnp.bfloat16)
    w2_bf = w2.astype(jnp.bfloat16)
    h = jnp.dot(x_bf, w1_bf, preferred_element_type=jnp.float32) + b1
    h = jnp.maximum(h, 0.0)
    out = jnp.dot(h.astype(jnp.bfloat16), w2_bf,
                  preferred_element_type=jnp.float32) + b2
    sq = jnp.sum(out * out, axis=1, keepdims=True)
    inv = jnp.where(sq == 0.0, jnp.ones_like(sq), jax.lax.rsqrt(sq))
    return out * inv


if __name__ == "__main__":
    key = jax.random.PRNGKey(0)
    kx, k1, kb1, k2, kb2 = jax.random.split(key, 5)

    B = 8      # small batch (single batch tile; larger B shards across TCs)
    D = 128    # "dim" for the HDCNN module (lane-aligned)

    x = jax.random.normal(kx, (B, D), dtype=jnp.float32)

    # Deterministic synthetic parameters (PyTorch-Linear-like uniform scale).
    lim1 = 1.0 / jnp.sqrt(jnp.float32(D))
    lim2 = 1.0 / jnp.sqrt(jnp.float32(HIDDEN))
    w1 = jax.random.uniform(k1, (D, HIDDEN), jnp.float32, -lim1, lim1)
    b1 = jax.random.uniform(kb1, (1, HIDDEN), jnp.float32, -lim1, lim1)
    w2 = jax.random.uniform(k2, (HIDDEN, D), jnp.float32, -lim2, lim2)
    b2 = jax.random.uniform(kb2, (1, D), jnp.float32, -lim2, lim2)

    out = hdcnn_forward(x, w1, b1, w2, b2)
    out = jax.block_until_ready(out)

    ref = reference_forward(x, w1, b1, w2, b2)
    assert out.shape == (B, D)
    assert jnp.allclose(out, ref, atol=1e-2, rtol=1e-2), "mismatch vs. reference"

    print("KERNEL_OK")
</pallas_src>

<mosaic_0001>
module attributes {stable_mosaic.version = 11 : i64} {
  func.func @hdcnn_resident_kernel(%arg0: i32, %arg1: memref<8x128xf32, #tpu.memory_space<vmem>>, %arg2: memref<128x2048xbf16, #tpu.memory_space<vmem>>, %arg3: memref<1x2048xf32, #tpu.memory_space<vmem>>, %arg4: memref<2048x128xbf16, #tpu.memory_space<vmem>>, %arg5: memref<1x128xf32, #tpu.memory_space<vmem>>, %arg6: memref<8x128xf32, #tpu.memory_space<vmem>>) attributes {dimension_semantics = [#tpu.dimension_semantics<parallel>], iteration_bounds = array<i64: 1>, scalar_prefetch = 0 : i64, scratch_operands = 0 : i64, tpu.core_type = #tpu.core_type<tc>, window_params = [{transform_indices = @transform_0, window_bounds = array<i64: 8, 128>}, {pipeline_mode = #tpu.pipeline_mode<synchronous>, transform_indices = @transform_1, window_bounds = array<i64: 128, 2048>}, {pipeline_mode = #tpu.pipeline_mode<synchronous>, transform_indices = @transform_2, window_bounds = array<i64: 1, 2048>}, {pipeline_mode = #tpu.pipeline_mode<synchronous>, transform_indices = @transform_3, window_bounds = array<i64: 2048, 128>}, {pipeline_mode = #tpu.pipeline_mode<synchronous>, transform_indices = @transform_4, window_bounds = array<i64: 1, 128>}, {transform_indices = @transform_5, window_bounds = array<i64: 8, 128>}]} {
    %c0 = arith.constant 0 : index
    %c0_0 = arith.constant 0 : index
    %0 = vector.load %arg1[%c0, %c0_0] : memref<8x128xf32, #tpu.memory_space<vmem>>, vector<8x128xf32>
    %1 = arith.truncf %0 : vector<8x128xf32> to vector<8x128xbf16>
    %c0_1 = arith.constant 0 : index
    %c0_2 = arith.constant 0 : index
    %2 = vector.load %arg2[%c0_1, %c0_2] : memref<128x2048xbf16, #tpu.memory_space<vmem>>, vector<128x2048xbf16>
    %cst = arith.constant dense<0.000000e+00> : vector<8x2048xf32>
    %3 = tpu.matmul %1, %2, %cst {dimension_numbers = #tpu.dot_dimension_numbers<[1], [0], [0], [1], [0, 0, 1, 1], [], []>} : vector<8x128xbf16>, vector<128x2048xbf16>, vector<8x2048xf32> -> vector<8x2048xf32>
    %c0_3 = arith.constant 0 : index
    %c0_4 = arith.constant 0 : index
    %4 = vector.load %arg3[%c0_3, %c0_4] : memref<1x2048xf32, #tpu.memory_space<vmem>>, vector<1x2048xf32>
    %5 = vector.broadcast %4 : vector<1x2048xf32> to vector<8x2048xf32>
    %6 = arith.addf %3, %5 : vector<8x2048xf32>
    %cst_5 = arith.constant 0.000000e+00 : f32
    %7 = vector.broadcast %cst_5 : f32 to vector<8x2048xf32>
    %8 = arith.maximumf %6, %7 : vector<8x2048xf32>
    %9 = arith.truncf %8 : vector<8x2048xf32> to vector<8x2048xbf16>
    %c0_6 = arith.constant 0 : index
    %c0_7 = arith.constant 0 : index
    %10 = vector.load %arg4[%c0_6, %c0_7] : memref<2048x128xbf16, #tpu.memory_space<vmem>>, vector<2048x128xbf16>
    %cst_8 = arith.constant dense<0.000000e+00> : vector<8x128xf32>
    %11 = tpu.matmul %9, %10, %cst_8 {dimension_numbers = #tpu.dot_dimension_numbers<[1], [0], [0], [1], [0, 0, 1, 1], [], []>} : vector<8x2048xbf16>, vector<2048x128xbf16>, vector<8x128xf32> -> vector<8x128xf32>
    %c0_9 = arith.constant 0 : index
    %c0_10 = arith.constant 0 : index
    %12 = vector.load %arg5[%c0_9, %c0_10] : memref<1x128xf32, #tpu.memory_space<vmem>>, vector<1x128xf32>
    %13 = vector.broadcast %12 : vector<1x128xf32> to vector<8x128xf32>
    %14 = arith.addf %11, %13 : vector<8x128xf32>
    %15 = arith.mulf %14, %14 : vector<8x128xf32>
    %cst_11 = arith.constant dense<0.000000e+00> : vector<8xf32>
    %16 = vector.multi_reduction <add>, %15, %cst_11 [1] : vector<8x128xf32> to vector<8xf32>
    %17 = vector.shape_cast %16 : vector<8xf32> to vector<8x1xf32>
    %cst_12 = arith.constant 0.000000e+00 : f32
    %18 = vector.broadcast %cst_12 : f32 to vector<8x1xf32>
    %19 = arith.cmpf oeq, %17, %18 : vector<8x1xf32>
    %cst_13 = arith.constant 1.000000e+00 : f32
    %20 = vector.broadcast %cst_13 : f32 to vector<8x1xf32>
    %21 = math.rsqrt %17 : vector<8x1xf32>
    %22 = arith.select %19, %20, %21 : vector<8x1xi1>, vector<8x1xf32>
    %23 = vector.broadcast %22 : vector<8x1xf32> to vector<8x128xf32>
    %24 = arith.mulf %14, %23 : vector<8x128xf32>
    %c0_14 = arith.constant 0 : index
    %c0_15 = arith.constant 0 : index
    %25 = vector.load %arg6[%c0_14, %c0_15] : memref<8x128xf32, #tpu.memory_space<vmem>>, vector<8x128xf32>
    tpu.vector_store %arg6[%c0_14, %c0_15], %24 {strides = array<i32>} : memref<8x128xf32, #tpu.memory_space<vmem>>, vector<8x128xf32>,
    return
  }
  func.func @transform_0(%arg0: i32) -> (i32, i32) {
    %c0_i32 = arith.constant 0 : i32
    %c0_i32_0 = arith.constant 0 : i32
    return %arg0, %c0_i32 : i32, i32
  }
  func.func @transform_1(%arg0: i32) -> (i32, i32) {
    %c0_i32 = arith.constant 0 : i32
    %c0_i32_0 = arith.constant 0 : i32
    %c0_i32_1 = arith.constant 0 : i32
    return %c0_i32, %c0_i32_0 : i32, i32
  }
  func.func @transform_2(%arg0: i32) -> (i32, i32) {
    %c0_i32 = arith.constant 0 : i32
    %c0_i32_0 = arith.constant 0 : i32
    %c0_i32_1 = arith.constant 0 : i32
    return %c0_i32, %c0_i32_0 : i32, i32
  }
  func.func @transform_3(%arg0: i32) -> (i32, i32) {
    %c0_i32 = arith.constant 0 : i32
    %c0_i32_0 = arith.constant 0 : i32
    %c0_i32_1 = arith.constant 0 : i32
    return %c0_i32, %c0_i32_0 : i32, i32
  }
  func.func @transform_4(%arg0: i32) -> (i32, i32) {
    %c0_i32 = arith.constant 0 : i32
    %c0_i32_0 = arith.constant 0 : i32
    %c0_i32_1 = arith.constant 0 : i32
    return %c0_i32, %c0_i32_0 : i32, i32
  }
  func.func @transform_5(%arg0: i32) -> (i32, i32) {
    %c0_i32 = arith.constant 0 : i32
    %c0_i32_0 = arith.constant 0 : i32
    return %arg0, %c0_i32 : i32, i32
  }
}

</mosaic_0001>

<bundles_post_ra>
// kernel: tpu_custom_call.1
= control target key start
LH: loop header
LB: loop body
LE: loop exit
PB: predicated region body
PF: predicated region fallthrough
CT: control target
= control target key end

     0   :  { %10 = vsyncpa [#allocation3], 0  ;;  %s3483_s0 = inlined_call_operand.hbm [shape: f32[8,128], index: 0, kind: input, shape index: {}]   ;;  %s3484_s1 = inlined_call_operand.hbm [shape: bf16[128,2048], index: 1, kind: input, shape index: {}]   ;;  %s3485_s2 = inlined_call_operand.hbm [shape: f32[1,2048], index: 2, kind: input, shape index: {}]   ;;  %s3486_s3 = inlined_call_operand.hbm [shape: bf16[2048,128], index: 3, kind: input, shape index: {}]   ;;  %s3487_s4 = inlined_call_operand.vmem [shape: f32[1,128], index: 4, kind: input, shape index: {}]   ;;  %s3488_s5 = inlined_call_operand.hbm [shape: f32[8,128], index: 5, kind: output, shape index: {}]  }
   0x1   :  { %11 = vsyncpa [#allocation6], 0 }
   0x2   :  { %12 = vsyncpa [#allocation9], 0 }
   0x3   :  { %13 = vsyncpa [#allocation4], 0  ;;  %s3343_s18 = smov [#allocation5]  }
   0x4   :  { %s29_s19 = sshll.u32 %s3343_s18, 4  ;;  %s30_s19 = int_to_ptr.vmem [resolvable:$true] %s29_s19 }
   0x5   :  { %s3243_s20 = scalar_lea.vmem %s30_s19, 16384  ;;  %p3248_p1 = scmp.lt.s32.totalorder %s30_s19, %s30_s19 }
   0x6   :  { %p3244_p0 = scmp.ne.s32.totalorder %s30_s19, %s3243_s20  ;;  %p3249_p2 = scmp.lt.s32.totalorder %s3243_s20, %s3243_s20 }
   0x8   :  { %p3250_p3 = por %p3249_p2, %p3248_p1 }
   0xa   :  { %p3251_p4 = pnand %p3250_p3, %p3244_p0 }
   0xc   :  { %3254 = shalt.err (!%p3251_p4)
}
   0xd   :  { %s3344_s21 = smov 1024   ;;  %s3345_s22 = smov 64  }
   0xe   :  { %35 = dma.hbm_to_vmem [thread:$0]  %s3484_s1, 16384, %s30_s19, [#allocation6], %s3344_s21, %s3344_s21, %s3345_s22  }
   0xf   :  { %s3346_s25 = smov [#allocation2]   ;;  %s3347_s27 = smov [#allocation7]  }
  0x10   :  { %s20_s26 = sshll.u32 %s3346_s25, 4  ;;  %s42_s28 = sshll.u32 %s3347_s27, 4  ;;  %s21_s26 = int_to_ptr.vmem [resolvable:$true] %s20_s26  ;;  %s43_s28 = int_to_ptr.vmem [resolvable:$true] %s42_s28 }
  0x11   :  { %s3263_s29 = scalar_lea.vmem %s21_s26, 128  ;;  %p3268_p6 = scmp.lt.s32.totalorder %s21_s26, %s21_s26 }
  0x12   :  { %p3264_p5 = scmp.ne.s32.totalorder %s21_s26, %s3263_s29  ;;  %p3269_p7 = scmp.lt.s32.totalorder %s3263_s29, %s3263_s29 }
  0x14   :  { %p3270_p8 = por %p3269_p7, %p3268_p6 }
  0x16   :  { %p3271_p9 = pnand %p3270_p8, %p3264_p5 }
  0x18   :  { %3274 = shalt.err (!%p3271_p9)
}
  0x19   :  { %23 = dma.hbm_to_vmem [thread:$0]  %s3483_s0, 128, %s21_s26, [#allocation3]  }
  0x1a   :  { %s3283_s7 = scalar_lea.vmem %s43_s28, 256  ;;  %p3288_p11 = scmp.lt.s32.totalorder %s43_s28, %s43_s28 }
  0x1b   :  { %p3284_p10 = scmp.ne.s32.totalorder %s43_s28, %s3283_s7  ;;  %p3289_p12 = scmp.lt.s32.totalorder %s3283_s7, %s3283_s7 }
  0x1d   :  { %p3290_p13 = por %p3289_p12, %p3288_p11 }
  0x1f   :  { %p3291_p0 = pnand %p3290_p13, %p3284_p10 }
  0x21   :  { %3294 = shalt.err (!%p3291_p0)
}
  0x22   :  { %45 = dma.hbm_to_vmem [thread:$0]  %s3485_s2, 256, %s43_s28, [#allocation6]  }
  0x23   :  { %s3348_s9 = smov [#allocation8]  }
  0x24   :  { %s51_s10 = sshll.u32 %s3348_s9, 4  ;;  %s52_s10 = int_to_ptr.vmem [resolvable:$true] %s51_s10 }
  0x25   :  { %s3303_s11 = scalar_lea.vmem %s52_s10, 16384  ;;  %p3308_p2 = scmp.lt.s32.totalorder %s52_s10, %s52_s10 }
  0x26   :  { %p3304_p1 = scmp.ne.s32.totalorder %s52_s10, %s3303_s11  ;;  %p3309_p3 = scmp.lt.s32.totalorder %s3303_s11, %s3303_s11 }
  0x28   :  { %p3310_p4 = por %p3309_p3, %p3308_p2 }
  0x2a   :  { %p3311_p5 = pnand %p3310_p4, %p3304_p1 }
  0x2c   :  { %3314 = shalt.err (!%p3311_p5)
}
  0x2d   :  { %s3349_s0 = smov 4  }
  0x2e   :  { %57 = dma.hbm_to_vmem [thread:$0]  %s3486_s3, 16384, %s52_s10, [#allocation9], %s3345_s22, %s3345_s22, %s3349_s0  }
  0x2f   :  { %3335 = dma.done.wait [#allocation3], 128  }
  0x30   :  { %3336 = vsyncadd [#allocation3], 4294967168 }
  0x31   :  { %3337 = dma.done.wait [#allocation6], 16640  }
  0x32   :  { %3338 = vsyncadd [#allocation6], 4294950656 }
  0x33   :  { %3339 = dma.done.wait [#allocation9], 16384  }
  0x34   :  { %3340 = vsyncadd [#allocation9], 4294950912  ;;  %v3350_v0 = vmov 0   ;;  %v187_v1 = vld [vmem:[#allocation5 + $0x380] sm:$0xff]  ;;  %v188_v3 = vld [vmem:[#allocation5 + $0x388] sm:$0xff] }
  0x35   :  { %959 = vmatprep.mubr.bf16.mxu0 %v3350_v0  ;;  %1000 = vmatprep.mubr.bf16.mxu1 %v3350_v0  ;;  %v195_v2 = vld [vmem:[#allocation5 + $0x3c0] sm:$0xff]  ;;  %v196_v5 = vld [vmem:[#allocation5 + $0x3c8] sm:$0xff]  ;;  %v189_v63 = vld [vmem:[#allocation5 + $0x390] sm:$0xff] }
  0x36   :  { %v2776_v4 = vcombine.high %v187_v1, %v195_v2  ;;  %v2775_v6 = vcombine.low %v187_v1, %v195_v2  ;;  %v171_v7 = vld [vmem:[#allocation5 + $0x300] sm:$0xff]  ;;  %v2778_v9 = vcombine.high %v188_v3, %v196_v5  ;;  %v2777_v10 = vcombine.low %v188_v3, %v196_v5  ;;  %v172_v12 = vld [vmem:[#allocation5 + $0x308] sm:$0xff]  ;;  %v197_v1 = vld [vmem:[#allocation5 + $0x3d0] sm:$0xff] }
  0x37   :  { %v179_v8 = vld [vmem:[#allocation5 + $0x340] sm:$0xff]  ;;  %v180_v13 = vld [vmem:[#allocation5 + $0x348] sm:$0xff]  ;;  %v190_v2 = vld [vmem:[#allocation5 + $0x398] sm:$0xff] }
  0x38   :  { %v2760_v11 = vcombine.high %v171_v7, %v179_v8  ;;  %v155_v14 = vld [vmem:[#allocation5 + $0x280] sm:$0xff]  ;;  %927 = vmatprep.subr.bf16.mxu0 %v2776_v4  ;;  %v2762_v15 = vcombine.high %v172_v12, %v180_v13  ;;  %v156_v17 = vld [vmem:[#allocation5 + $0x288] sm:$0xff]  ;;  %968 = vmatprep.subr.bf16.mxu1 %v2778_v9  ;;  %v2759_v19 = vcombine.low %v171_v7, %v179_v8  ;;  %v198_v3 = vld [vmem:[#allocation5 + $0x3d8] sm:$0xff] }
  0x39   :  { %v163_v16 = vld [vmem:[#allocation5 + $0x2c0] sm:$0xff]  ;;  %v164_v18 = vld [vmem:[#allocation5 + $0x2c8] sm:$0xff]  ;;  %928 = vmatpush1.bf16.msra.mxu0 %v2775_v6  ;;  %969 = vmatpush1.bf16.msra.mxu1 %v2777_v10  ;;  %v2761_v20 = vcombine.low %v172_v12, %v180_v13  ;;  %v73_v5 = vld [vmem:[#allocation2] sm:$0xff]  ;;  %v2780_v7 = vcombine.high %v189_v63, %v197_v1  ;;  %v2782_v8 = vcombine.high %v190_v2, %v198_v3 }
  0x3a   :  { %929 = vmatprep.subr.bf16.mxu0 %v2760_v11  ;;  %v2744_v21 = vcombine.high %v155_v14, %v163_v16  ;;  %970 = vmatprep.subr.bf16.mxu1 %v2762_v15  ;;  %v2746_v22 = vcombine.high %v156_v17, %v164_v18  ;;  %v139_v23 = vld [vmem:[#allocation5 + $0x200] sm:$0xff]  ;;  %v140_v25 = vld [vmem:[#allocation5 + $0x208] sm:$0xff]  ;;  %v2743_v27 = vcombine.low %v155_v14, %v163_v16  ;;  %v173_v9 = vld [vmem:[#allocation5 + $0x310] sm:$0xff] }
  0x3b   :  { %v147_v24 = vld [vmem:[#allocation5 + $0x240] sm:$0xff]  ;;  %v148_v26 = vld [vmem:[#allocation5 + $0x248] sm:$0xff]  ;;  %v2745_v28 = vcombine.low %v156_v17, %v164_v18  ;;  %v181_v10 = vld [vmem:[#allocation5 + $0x350] sm:$0xff]  ;;  %v3399_v11 = vpack.c.bf16 %v73_v5, %v73_v5  ;;  %v2779_v14 = vcombine.low %v189_v63, %v197_v1  ;;  %v2781_v15 = vcombine.low %v190_v2, %v198_v3 }
  0x3c   :  { %v2728_v29 = vcombine.high %v139_v23, %v147_v24  ;;  %v2730_v30 = vcombine.high %v140_v25, %v148_v26  ;;  %v123_v31 = vld [vmem:[#allocation5 + $0x180] sm:$0xff]  ;;  %v124_v33 = vld [vmem:[#allocation5 + $0x188] sm:$0xff]  ;;  %v2727_v35 = vcombine.low %v139_v23, %v147_v24  ;;  %v2729_v36 = vcombine.low %v140_v25, %v148_v26  ;;  %v174_v12 = vld [vmem:[#allocation5 + $0x318] sm:$0xff] }
  0x3d   :  { %930 = vmatpush1.bf16.msra.mxu0 %v2759_v19  ;;  %971 = vmatpush1.bf16.msra.mxu1 %v2761_v20  ;;  %v131_v32 = vld [vmem:[#allocation5 + $0x1c0] sm:$0xff]  ;;  %v132_v34 = vld [vmem:[#allocation5 + $0x1c8] sm:$0xff]  ;;  %v182_v13 = vld [vmem:[#allocation5 + $0x358] sm:$0xff]  ;;  %v2764_v16 = vcombine.high %v173_v9, %v181_v10 }
  0x3e   :  { %931 = vmatprep.subr.bf16.mxu0 %v2744_v21  ;;  %972 = vmatprep.subr.bf16.mxu1 %v2746_v22  ;;  %v2712_v37 = vcombine.high %v123_v31, %v131_v32  ;;  %v2714_v38 = vcombine.high %v124_v33, %v132_v34  ;;  %v107_v39 = vld [vmem:[#allocation5 + $0x100] sm:$0xff]  ;;  %v108_v41 = vld [vmem:[#allocation5 + $0x108] sm:$0xff]  ;;  %v2711_v43 = vcombine.low %v123_v31, %v131_v32  ;;  %v157_v18 = vld [vmem:[#allocation5 + $0x290] sm:$0xff] }
  0x3f   :  { %v115_v40 = vld [vmem:[#allocation5 + $0x140] sm:$0xff]  ;;  %v116_v42 = vld [vmem:[#allocation5 + $0x148] sm:$0xff]  ;;  %v2713_v44 = vcombine.low %v124_v33, %v132_v34  ;;  %v2766_v17 = vcombine.high %v174_v12, %v182_v13  ;;  %v165_v19 = vld [vmem:[#allocation5 + $0x2d0] sm:$0xff]  ;;  %v2763_v22 = vcombine.low %v173_v9, %v181_v10  ;;  %v2765_v23 = vcombine.low %v174_v12, %v182_v13 }
  0x40   :  { %v2696_v45 = vcombine.high %v107_v39, %v115_v40  ;;  %v2698_v46 = vcombine.high %v108_v41, %v116_v42  ;;  %v91_v47 = vld [vmem:[#allocation5 + $0x80] sm:$0xff]  ;;  %v92_v49 = vld [vmem:[#allocation5 + $0x88] sm:$0xff]  ;;  %v2695_v51 = vcombine.low %v107_v39, %v115_v40  ;;  %v2697_v52 = vcombine.low %v108_v41, %v116_v42  ;;  %v158_v20 = vld [vmem:[#allocation5 + $0x298] sm:$0xff] }
  0x41   :  { %932 = vmatpush1.bf16.msra.mxu0 %v2743_v27  ;;  %973 = vmatpush1.bf16.msra.mxu1 %v2745_v28  ;;  %v99_v48 = vld [vmem:[#allocation5 + $0xc0] sm:$0xff]  ;;  %v100_v50 = vld [vmem:[#allocation5 + $0xc8] sm:$0xff]  ;;  %v166_v21 = vld [vmem:[#allocation5 + $0x2d8] sm:$0xff]  ;;  %v2748_v24 = vcombine.high %v157_v18, %v165_v19 }
  0x42   :  { %933 = vmatprep.subr.bf16.mxu0 %v2728_v29  ;;  %974 = vmatprep.subr.bf16.mxu1 %v2730_v30  ;;  %v2680_v53 = vcombine.high %v91_v47, %v99_v48  ;;  %v2682_v54 = vcombine.high %v92_v49, %v100_v50  ;;  %v75_v55 = vld [vmem:[#allocation5] sm:$0xff]  ;;  %v76_v57 = vld [vmem:[#allocation5 + $0x8] sm:$0xff]  ;;  %v2679_v59 = vcombine.low %v91_v47, %v99_v48  ;;  %v141_v26 = vld [vmem:[#allocation5 + $0x210] sm:$0xff] }
  0x43   :  { %v83_v56 = vld [vmem:[#allocation5 + $0x40] sm:$0xff]  ;;  %v84_v58 = vld [vmem:[#allocation5 + $0x48] sm:$0xff]  ;;  %v2681_v60 = vcombine.low %v92_v49, %v100_v50  ;;  %v2750_v25 = vcombine.high %v158_v20, %v166_v21  ;;  %v149_v27 = vld [vmem:[#allocation5 + $0x250] sm:$0xff]  ;;  %v2747_v30 = vcombine.low %v157_v18, %v165_v19  ;;  %v2749_v31 = vcombine.low %v158_v20, %v166_v21 }
  0x44   :  { %v2664_v61 = vcombine.high %v75_v55, %v83_v56  ;;  %v2666_v62 = vcombine.high %v76_v57, %v84_v58  ;;  %v2663_v4 = vcombine.low %v75_v55, %v83_v56  ;;  %v2665_v6 = vcombine.low %v76_v57, %v84_v58  ;;  %v142_v28 = vld [vmem:[#allocation5 + $0x218] sm:$0xff]  ;;  %v125_v34 = vld [vmem:[#allocation5 + $0x190] sm:$0xff]  ;;  %v191_v63 = vld [vmem:[#allocation5 + $0x3a0] sm:$0xff] }
  0x45   :  { %934 = vmatpush1.bf16.msra.mxu0 %v2727_v35  ;;  %975 = vmatpush1.bf16.msra.mxu1 %v2729_v36  ;;  %v150_v29 = vld [vmem:[#allocation5 + $0x258] sm:$0xff]  ;;  %v2732_v32 = vcombine.high %v141_v26, %v149_v27  ;;  %v133_v35 = vld [vmem:[#allocation5 + $0x1d0] sm:$0xff]  ;;  %v199_v3 = vld [vmem:[#allocation5 + $0x3e0] sm:$0xff] }
  0x46   :  { %935 = vmatprep.subr.bf16.mxu0 %v2712_v37  ;;  %976 = vmatprep.subr.bf16.mxu1 %v2714_v38  ;;  %v2734_v33 = vcombine.high %v142_v28, %v150_v29  ;;  %v126_v36 = vld [vmem:[#allocation5 + $0x198] sm:$0xff]  ;;  %v2731_v38 = vcombine.low %v141_v26, %v149_v27  ;;  %v109_v39 = vld [vmem:[#allocation5 + $0x110] sm:$0xff]  ;;  %v2733_v40 = vcombine.low %v142_v28, %v150_v29  ;;  %v192_v5 = vld [vmem:[#allocation5 + $0x3a8] sm:$0xff] }
  0x47   :  { %v134_v37 = vld [vmem:[#allocation5 + $0x1d8] sm:$0xff]  ;;  %v2716_v41 = vcombine.high %v125_v34, %v133_v35  ;;  %v117_v42 = vld [vmem:[#allocation5 + $0x150] sm:$0xff]  ;;  %v2784_v10 = vcombine.high %v191_v63, %v199_v3  ;;  %v183_v12 = vld [vmem:[#allocation5 + $0x360] sm:$0xff] }
  0x48   :  { %v93_v47 = vld [vmem:[#allocation5 + $0x90] sm:$0xff]  ;;  %v2717_v48 = vcombine.low %v126_v36, %v134_v37  ;;  %v2700_v49 = vcombine.high %v109_v39, %v117_v42  ;;  %v167_v20 = vld [vmem:[#allocation5 + $0x2e0] sm:$0xff]  ;;  %v144_v29 = vld [vmem:[#allocation5 + $0x228] sm:$0xff] }
  0x49   :  { %936 = vmatpush1.bf16.msra.mxu0 %v2711_v43  ;;  %977 = vmatpush1.bf16.msra.mxu1 %v2713_v44  ;;  %v2718_v43 = vcombine.high %v126_v36, %v134_v37  ;;  %v110_v44 = vld [vmem:[#allocation5 + $0x118] sm:$0xff]  ;;  %v101_v50 = vld [vmem:[#allocation5 + $0xd0] sm:$0xff]  ;;  %v151_v26 = vld [vmem:[#allocation5 + $0x260] sm:$0xff] }
  0x4a   :  { %937 = vmatprep.subr.bf16.mxu0 %v2696_v45  ;;  %978 = vmatprep.subr.bf16.mxu1 %v2698_v46  ;;  %v118_v45 = vld [vmem:[#allocation5 + $0x158] sm:$0xff]  ;;  %v2715_v46 = vcombine.low %v125_v34, %v133_v35  ;;  %v77_v55 = vld [vmem:[#allocation5 + $0x10] sm:$0xff]  ;;  %v2684_v57 = vcombine.high %v93_v47, %v101_v50  ;;  %v135_v34 = vld [vmem:[#allocation5 + $0x1e0] sm:$0xff] }
  0x4b   :  { %v2701_v56 = vcombine.low %v110_v44, %v118_v45  ;;  %v85_v58 = vld [vmem:[#allocation5 + $0x50] sm:$0xff]  ;;  %v128_v37 = vld [vmem:[#allocation5 + $0x1a8] sm:$0xff] }
  0x4c   :  { %v2668_v2 = vcombine.high %v77_v55, %v85_v58 }
  0x4d   :  { %938 = vmatpush1.bf16.msra.mxu0 %v2695_v51  ;;  %979 = vmatpush1.bf16.msra.mxu1 %v2697_v52  ;;  %v2702_v51 = vcombine.high %v110_v44, %v118_v45  ;;  %v94_v52 = vld [vmem:[#allocation5 + $0x98] sm:$0xff]  ;;  %v112_v45 = vld [vmem:[#allocation5 + $0x128] sm:$0xff] }
  0x4e   :  { %939 = vmatprep.subr.bf16.mxu0 %v2680_v53  ;;  %980 = vmatprep.subr.bf16.mxu1 %v2682_v54  ;;  %v102_v53 = vld [vmem:[#allocation5 + $0xd8] sm:$0xff]  ;;  %v2699_v54 = vcombine.low %v109_v39, %v117_v42  ;;  %v119_v42 = vld [vmem:[#allocation5 + $0x160] sm:$0xff] }
  0x4f   :  { %v2685_v1 = vcombine.low %v94_v52, %v102_v53 }
  0x51   :  { %940 = vmatpush1.bf16.msra.mxu0 %v2679_v59  ;;  %981 = vmatpush1.bf16.msra.mxu1 %v2681_v60  ;;  %v2686_v59 = vcombine.high %v94_v52, %v102_v53  ;;  %v78_v60 = vld [vmem:[#allocation5 + $0x18] sm:$0xff]  ;;  %v96_v53 = vld [vmem:[#allocation5 + $0xa8] sm:$0xff] }
  0x52   :  { %941 = vmatprep.subr.bf16.mxu0 %v2664_v61  ;;  %982 = vmatprep.subr.bf16.mxu1 %v2666_v62  ;;  %v86_v61 = vld [vmem:[#allocation5 + $0x58] sm:$0xff]  ;;  %v2683_v62 = vcombine.low %v93_v47, %v101_v50  ;;  %v103_v50 = vld [vmem:[#allocation5 + $0xe0] sm:$0xff] }
  0x53   :  { %v2669_v9 = vcombine.low %v78_v60, %v86_v61 }
  0x55   :  { %942 = vmatpush1.bf16.msra.mxu0 %v2663_v4  ;;  %983 = vmatpush1.bf16.msra.mxu1 %v2665_v6  ;;  %v2670_v4 = vcombine.high %v78_v60, %v86_v61  ;;  %v200_v6 = vld [vmem:[#allocation5 + $0x3e8] sm:$0xff] }
  0x56   :  { %1009 = vmatprep.subr.bf16.mxu0 %v2780_v7  ;;  %1050 = vmatprep.subr.bf16.mxu1 %v2782_v8  ;;  %v2667_v7 = vcombine.low %v77_v55, %v85_v58  ;;  %v175_v8 = vld [vmem:[#allocation5 + $0x320] sm:$0xff]  ;;  %v2786_v13 = vcombine.high %v192_v5, %v200_v6  ;;  %v2785_v18 = vcombine.low %v192_v5, %v200_v6  ;;  %v80_v61 = vld [vmem:[#allocation5 + $0x28] sm:$0xff]  ;;  %v194_v6 = vld [vmem:[#allocation5 + $0x3b8] sm:$0xff] }
  0x57   :  { %v2768_v19 = vcombine.high %v175_v8, %v183_v12  ;;  %v87_v58 = vld [vmem:[#allocation5 + $0x60] sm:$0xff] }
  0x58   :  { %960 = vmatmul.mubr.bf16.vlgmr.msra.gmra.mxu0 %v3399_v11  ;;  %1001 = vmatmul.mubr.bf16.vlgmr.msra.gmra.mxu1 %v3399_v11 }
  0x59   :  { %1010 = vmatpush1.bf16.msra.mxu0 %v2779_v14  ;;  %1051 = vmatpush1.bf16.msra.mxu1 %v2781_v15  ;;  %v176_v14 = vld [vmem:[#allocation5 + $0x328] sm:$0xff] }
  0x5a   :  { %1011 = vmatprep.subr.bf16.mxu0 %v2764_v16  ;;  %1052 = vmatprep.subr.bf16.mxu1 %v2766_v17  ;;  %v184_v15 = vld [vmem:[#allocation5 + $0x368] sm:$0xff]  ;;  %v2783_v16 = vcombine.low %v191_v63, %v199_v3  ;;  %v159_v17 = vld [vmem:[#allocation5 + $0x2a0] sm:$0xff]  ;;  %v201_v3 = vld [vmem:[#allocation5 + $0x3f0] sm:$0xff] }
  0x5b   :  { %1041 = vmatprep.mubr.bf16.mxu0 %v3350_v0  ;;  %1082 = vmatprep.mubr.bf16.mxu1 %v3350_v0  ;;  %v2770_v21 = vcombine.high %v176_v14, %v184_v15  ;;  %v2769_v27 = vcombine.low %v176_v14, %v184_v15  ;;  %v2752_v28 = vcombine.high %v159_v17, %v167_v20  ;;  %v178_v15 = vld [vmem:[#allocation5 + $0x338] sm:$0xff] }
  0x5d   :  { %1012 = vmatpush1.bf16.msra.mxu0 %v2763_v22  ;;  %1053 = vmatpush1.bf16.msra.mxu1 %v2765_v23  ;;  %v160_v22 = vld [vmem:[#allocation5 + $0x2a8] sm:$0xff] }
  0x5e   :  { %1013 = vmatprep.subr.bf16.mxu0 %v2748_v24  ;;  %1054 = vmatprep.subr.bf16.mxu1 %v2750_v25  ;;  %v168_v23 = vld [vmem:[#allocation5 + $0x2e8] sm:$0xff]  ;;  %v2767_v24 = vcombine.low %v175_v8, %v183_v12  ;;  %v143_v25 = vld [vmem:[#allocation5 + $0x220] sm:$0xff]  ;;  %v185_v12 = vld [vmem:[#allocation5 + $0x370] sm:$0xff] }
  0x5f   :  { %v2753_v35 = vcombine.low %v160_v22, %v168_v23  ;;  %v2736_v36 = vcombine.high %v143_v25, %v151_v26 }
  0x61   :  { %1014 = vmatpush1.bf16.msra.mxu0 %v2747_v30  ;;  %1055 = vmatpush1.bf16.msra.mxu1 %v2749_v31  ;;  %v152_v30 = vld [vmem:[#allocation5 + $0x268] sm:$0xff]  ;;  %v2754_v31 = vcombine.high %v160_v22, %v168_v23  ;;  %v162_v23 = vld [vmem:[#allocation5 + $0x2b8] sm:$0xff] }
  0x62   :  { %1015 = vmatprep.subr.bf16.mxu0 %v2732_v32  ;;  %1056 = vmatprep.subr.bf16.mxu1 %v2734_v33  ;;  %v2751_v32 = vcombine.low %v159_v17, %v167_v20  ;;  %v127_v33 = vld [vmem:[#allocation5 + $0x1a0] sm:$0xff]  ;;  %v2738_v39 = vcombine.high %v144_v29, %v152_v30  ;;  %v169_v20 = vld [vmem:[#allocation5 + $0x2f0] sm:$0xff] }
  0x63   :  { %v2720_v44 = vcombine.high %v127_v33, %v135_v34 }
  0x65   :  { %1016 = vmatpush1.bf16.msra.mxu0 %v2731_v38  ;;  %1057 = vmatpush1.bf16.msra.mxu1 %v2733_v40  ;;  %v136_v38 = vld [vmem:[#allocation5 + $0x1e8] sm:$0xff]  ;;  %v2735_v40 = vcombine.low %v143_v25, %v151_v26  ;;  %v170_v25 = vld [vmem:[#allocation5 + $0x2f8] sm:$0xff] }
  0x66   :  { %1017 = vmatprep.subr.bf16.mxu0 %v2716_v41  ;;  %1058 = vmatprep.subr.bf16.mxu1 %v2718_v43  ;;  %v111_v41 = vld [vmem:[#allocation5 + $0x120] sm:$0xff]  ;;  %v2737_v43 = vcombine.low %v144_v29, %v152_v30  ;;  %v2722_v47 = vcombine.high %v128_v37, %v136_v38 }
  0x67   :  { %v2704_v52 = vcombine.high %v111_v41, %v119_v42 }
  0x69   :  { %1018 = vmatpush1.bf16.msra.mxu0 %v2715_v46  ;;  %1059 = vmatpush1.bf16.msra.mxu1 %v2717_v48  ;;  %v120_v46 = vld [vmem:[#allocation5 + $0x168] sm:$0xff]  ;;  %v2719_v48 = vcombine.low %v127_v33, %v135_v34  ;;  %v2758_v33 = vcombine.high %v162_v23, %v170_v25 }
  0x6a   :  { %1019 = vmatprep.subr.bf16.mxu0 %v2700_v49  ;;  %1060 = vmatprep.subr.bf16.mxu1 %v2702_v51  ;;  %v95_v49 = vld [vmem:[#allocation5 + $0xa0] sm:$0xff]  ;;  %v2721_v51 = vcombine.low %v128_v37, %v136_v38  ;;  %v2706_v55 = vcombine.high %v112_v45, %v120_v46  ;;  %v2757_v37 = vcombine.low %v162_v23, %v170_v25  ;;  %v3119_v23 = vld [vmem:[#allocation8 + $0x20] sm:$0xff]   ;;  %v3122_v25 = vld [vmem:[#allocation8 + $0xd8] sm:$0xff]  }
  0x6b   :  { %v2688_v60 = vcombine.high %v95_v49, %v103_v50 }
  0x6d   :  { %1020 = vmatpush1.bf16.msra.mxu0 %v2699_v54  ;;  %1061 = vmatpush1.bf16.msra.mxu1 %v2701_v56  ;;  %v104_v54 = vld [vmem:[#allocation5 + $0xe8] sm:$0xff]  ;;  %v2703_v56 = vcombine.low %v111_v41, %v119_v42 }
  0x6e   :  { %1021 = vmatprep.subr.bf16.mxu0 %v2684_v57  ;;  %1062 = vmatprep.subr.bf16.mxu1 %v2686_v59  ;;  %v79_v57 = vld [vmem:[#allocation5 + $0x20] sm:$0xff]  ;;  %v2705_v59 = vcombine.low %v112_v45, %v120_v46  ;;  %v2690_v63 = vcombine.high %v96_v53, %v104_v54  ;;  %v113_v45 = vld [vmem:[#allocation5 + $0x130] sm:$0xff] }
  0x6f   :  { %v2672_v5 = vcombine.high %v79_v57, %v87_v58 }
  0x71   :  { %1022 = vmatpush1.bf16.msra.mxu0 %v2683_v62  ;;  %1063 = vmatpush1.bf16.msra.mxu1 %v2685_v1  ;;  %v88_v62 = vld [vmem:[#allocation5 + $0x68] sm:$0xff]  ;;  %v2687_v1 = vcombine.low %v95_v49, %v103_v50  ;;  %v97_v50 = vld [vmem:[#allocation5 + $0xb0] sm:$0xff] }
  0x72   :  { %1023 = vmatprep.subr.bf16.mxu0 %v2668_v2  ;;  %1064 = vmatprep.subr.bf16.mxu1 %v2670_v4  ;;  %v193_v2 = vld [vmem:[#allocation5 + $0x3b0] sm:$0xff]  ;;  %v2689_v4 = vcombine.low %v96_v53, %v104_v54  ;;  %v2674_v8 = vcombine.high %v80_v61, %v88_v62 }
  0x73   :  { %v2788_v14 = vcombine.high %v193_v2, %v201_v3  ;;  %v105_v53 = vld [vmem:[#allocation5 + $0xf0] sm:$0xff] }
  0x75   :  { %1024 = vmatpush1.bf16.msra.mxu0 %v2667_v7  ;;  %1065 = vmatpush1.bf16.msra.mxu1 %v2669_v9  ;;  %v202_v7 = vld [vmem:[#allocation5 + $0x3f8] sm:$0xff]  ;;  %v2671_v9 = vcombine.low %v79_v57, %v87_v58  ;;  %v81_v58 = vld [vmem:[#allocation5 + $0x30] sm:$0xff] }
  0x76   :  { %1091 = vmatprep.subr.bf16.mxu0 %v2784_v10  ;;  %1132 = vmatprep.subr.bf16.mxu1 %v2786_v13  ;;  %v177_v10 = vld [vmem:[#allocation5 + $0x330] sm:$0xff]  ;;  %v2673_v13 = vcombine.low %v80_v61, %v88_v62  ;;  %v2790_v17 = vcombine.high %v194_v6, %v202_v7 }
  0x77   :  { %v2772_v22 = vcombine.high %v177_v10, %v185_v12  ;;  %v2771_v26 = vcombine.low %v177_v10, %v185_v12  ;;  %v89_v61 = vld [vmem:[#allocation5 + $0x70] sm:$0xff]  ;;  %v3107_v10 = vld [vmem:[#allocation8 + $0x38] sm:$0xff]  }
  0x78   :  { %1042 = vmatmul.mubr.bf16.vlgmr.msra.gmra.mxu0 %v3399_v11  ;;  %1083 = vmatmul.mubr.bf16.vlgmr.msra.gmra.mxu1 %v3399_v11  ;;  %v3108_v12 = vld [vmem:[#allocation8 + $0xb8] sm:$0xff]  }
  0x79   :  { %1092 = vmatpush1.bf16.msra.mxu0 %v2783_v16  ;;  %1133 = vmatpush1.bf16.msra.mxu1 %v2785_v18  ;;  %v186_v16 = vld [vmem:[#allocation5 + $0x378] sm:$0xff]  ;;  %v2787_v18 = vcombine.low %v193_v2, %v201_v3  ;;  %v2691_v2 = vcombine.low %v97_v50, %v105_v53 }
  0x7a   :  { %1093 = vmatprep.subr.bf16.mxu0 %v2768_v19  ;;  %1134 = vmatprep.subr.bf16.mxu1 %v2770_v21  ;;  %v161_v19 = vld [vmem:[#allocation5 + $0x2b0] sm:$0xff]  ;;  %v2789_v21 = vcombine.low %v194_v6, %v202_v7  ;;  %v2773_v29 = vcombine.low %v178_v15, %v186_v16  ;;  %v2675_v6 = vcombine.low %v81_v58, %v89_v61  ;;  %v3105_v7 = vld [vmem:[#allocation8 + $0x78] sm:$0xff]  }
  0x7b   :  { %1123 = vmatprep.mubr.bf16.mxu0 %v3350_v0  ;;  %1164 = vmatprep.mubr.bf16.mxu1 %v3350_v0  ;;  %v2756_v30 = vcombine.high %v161_v19, %v169_v20  ;;  %v2755_v34 = vcombine.low %v161_v19, %v169_v20  ;;  %v3115_v19 = vld [vmem:[#allocation8 + $0x28] sm:$0xff]  }
  0x7c   :  { %v3116_v20 = vld [vmem:[#allocation8 + $0xa8] sm:$0xff]  }
  0x7d   :  { %1094 = vmatpush1.bf16.msra.mxu0 %v2767_v24  ;;  %1135 = vmatpush1.bf16.msra.mxu1 %v2769_v27  ;;  %v2774_v24 = vcombine.high %v178_v15, %v186_v16  ;;  %v145_v27 = vld [vmem:[#allocation5 + $0x230] sm:$0xff]  ;;  %v3111_v15 = vld [vmem:[#allocation8 + $0x30] sm:$0xff]  }
  0x7e   :  { %1095 = vmatprep.subr.bf16.mxu0 %v2752_v28  ;;  %1136 = vmatprep.subr.bf16.mxu1 %v2754_v31  ;;  %v153_v28 = vld [vmem:[#allocation5 + $0x270] sm:$0xff]  ;;  %v146_v31 = vld [vmem:[#allocation5 + $0x238] sm:$0xff]  ;;  %v3112_v16 = vld [vmem:[#allocation8 + $0xb0] sm:$0xff]  }
  0x7f   :  { %v2740_v38 = vcombine.high %v145_v27, %v153_v28  ;;  %v2739_v42 = vcombine.low %v145_v27, %v153_v28  ;;  %v3124_v27 = vld [vmem:[#allocation8 + $0x98] sm:$0xff]   ;;  %v3125_v28 = vld [vmem:[#allocation8 + $0x50] sm:$0xff]  }
  0x81   :  { %1096 = vmatpush1.bf16.msra.mxu0 %v2751_v32  ;;  %1137 = vmatpush1.bf16.msra.mxu1 %v2753_v35  ;;  %v154_v32 = vld [vmem:[#allocation5 + $0x278] sm:$0xff]  ;;  %v129_v35 = vld [vmem:[#allocation5 + $0x1b0] sm:$0xff] }
  0x82   :  { %1097 = vmatprep.subr.bf16.mxu0 %v2736_v36  ;;  %1138 = vmatprep.subr.bf16.mxu1 %v2738_v39  ;;  %v137_v36 = vld [vmem:[#allocation5 + $0x1f0] sm:$0xff]  ;;  %v130_v39 = vld [vmem:[#allocation5 + $0x1b8] sm:$0xff]  ;;  %v2742_v41 = vcombine.high %v146_v31, %v154_v32 }
  0x83   :  { %v2723_v49 = vcombine.low %v129_v35, %v137_v36 }
  0x85   :  { %1098 = vmatpush1.bf16.msra.mxu0 %v2735_v40  ;;  %1139 = vmatpush1.bf16.msra.mxu1 %v2737_v43  ;;  %v138_v40 = vld [vmem:[#allocation5 + $0x1f8] sm:$0xff]  ;;  %v2741_v43 = vcombine.low %v146_v31, %v154_v32  ;;  %v3128_v31 = vld [vmem:[#allocation8 + $0x90] sm:$0xff]  }
  0x86   :  { %1099 = vmatprep.subr.bf16.mxu0 %v2720_v44  ;;  %1140 = vmatprep.subr.bf16.mxu1 %v2722_v47  ;;  %v2724_v44 = vcombine.high %v129_v35, %v137_v36  ;;  %v2726_v46 = vcombine.high %v130_v39, %v138_v40  ;;  %v114_v47 = vld [vmem:[#allocation5 + $0x138] sm:$0xff]  ;;  %v3133_v36 = vld [vmem:[#allocation8 + $0x40] sm:$0xff]  }
  0x87   :  { %v3129_v32 = vld [vmem:[#allocation8 + $0x48] sm:$0xff]  }
  0x88   :  { %v3132_v35 = vld [vmem:[#allocation8 + $0x88] sm:$0xff]  }
  0x89   :  { %1100 = vmatpush1.bf16.msra.mxu0 %v2719_v48  ;;  %1141 = vmatpush1.bf16.msra.mxu1 %v2721_v51  ;;  %v122_v48 = vld [vmem:[#allocation5 + $0x178] sm:$0xff]  ;;  %v2725_v51 = vcombine.low %v130_v39, %v138_v40  ;;  %v3136_v39 = vld [vmem:[#allocation8 + $0x80] sm:$0xff]   ;;  %v3137_v40 = vld [vmem:[#allocation8 + $0x178] sm:$0xff]  }
  0x8a   :  { %1101 = vmatprep.subr.bf16.mxu0 %v2704_v52  ;;  %1142 = vmatprep.subr.bf16.mxu1 %v2706_v55  ;;  %v2710_v54 = vcombine.high %v114_v47, %v122_v48  ;;  %v98_v55 = vld [vmem:[#allocation5 + $0xb8] sm:$0xff] }
  0x8d   :  { %1102 = vmatpush1.bf16.msra.mxu0 %v2703_v56  ;;  %1143 = vmatpush1.bf16.msra.mxu1 %v2705_v59  ;;  %v106_v56 = vld [vmem:[#allocation5 + $0xf8] sm:$0xff]  ;;  %v2709_v59 = vcombine.low %v114_v47, %v122_v48 }
  0x8e   :  { %1103 = vmatprep.subr.bf16.mxu0 %v2688_v60  ;;  %1144 = vmatprep.subr.bf16.mxu1 %v2690_v63  ;;  %v2692_v60 = vcombine.high %v97_v50, %v105_v53  ;;  %v2694_v62 = vcombine.high %v98_v55, %v106_v56  ;;  %v82_v63 = vld [vmem:[#allocation5 + $0x38] sm:$0xff]  ;;  %v2693_v3 = vcombine.low %v98_v55, %v106_v56 }
  0x91   :  { %1104 = vmatpush1.bf16.msra.mxu0 %v2687_v1  ;;  %1145 = vmatpush1.bf16.msra.mxu1 %v2689_v4  ;;  %v90_v1 = vld [vmem:[#allocation5 + $0x78] sm:$0xff]  ;;  %v2676_v4 = vcombine.high %v81_v58, %v89_v61 }
  0x92   :  { %1105 = vmatprep.subr.bf16.mxu0 %v2672_v5  ;;  %1146 = vmatprep.subr.bf16.mxu1 %v2674_v8  ;;  %v2678_v5 = vcombine.high %v82_v63, %v90_v1  ;;  %v2677_v8 = vcombine.low %v82_v63, %v90_v1 }
  0x95   :  { %1106 = vmatpush1.bf16.msra.mxu0 %v2671_v9  ;;  %1147 = vmatpush1.bf16.msra.mxu1 %v2673_v13  ;;  %v3106_v9 = vld [vmem:[#allocation8 + $0xf8] sm:$0xff]   ;;  %v3109_v13 = vld [vmem:[#allocation8 + $0x70] sm:$0xff]  }
  0x96   :  { %1173 = vmatprep.subr.bf16.mxu0 %v2788_v14  ;;  %1214 = vmatprep.subr.bf16.mxu1 %v2790_v17  ;;  %v3110_v14 = vld [vmem:[#allocation8 + $0xf0] sm:$0xff]   ;;  %v3113_v17 = vld [vmem:[#allocation8 + $0x68] sm:$0xff]  }
  0x98   :  { %1124 = vmatmul.mubr.bf16.vlgmr.msra.gmra.mxu0 %v3399_v11  ;;  %1165 = vmatmul.mubr.bf16.vlgmr.msra.gmra.mxu1 %v3399_v11 }
  0x99   :  { %1174 = vmatpush1.bf16.msra.mxu0 %v2787_v18  ;;  %1215 = vmatpush1.bf16.msra.mxu1 %v2789_v21  ;;  %v3114_v18 = vld [vmem:[#allocation8 + $0xe8] sm:$0xff]   ;;  %v3117_v21 = vld [vmem:[#allocation8 + $0x60] sm:$0xff]  }
  0x9a   :  { %1175 = vmatprep.subr.bf16.mxu0 %v2772_v22  ;;  %1216 = vmatprep.subr.bf16.mxu1 %v2774_v24  ;;  %v3118_v22 = vld [vmem:[#allocation8 + $0xe0] sm:$0xff]  }
  0x9b   :  { %1205 = vmatprep.mubr.bf16.mxu0 %v3350_v0  ;;  %1246 = vmatprep.mubr.bf16.mxu1 %v3350_v0  ;;  %v121_v0 = vld [vmem:[#allocation5 + $0x170] sm:$0xff] }
  0x9c   :  { %v2708_v52 = vcombine.high %v113_v45, %v121_v0  ;;  %v2707_v57 = vcombine.low %v113_v45, %v121_v0  ;;  %v3120_v24 = vld [vmem:[#allocation8 + $0xa0] sm:$0xff]   ;;  %v3418_v45 = vld [vmem:[#allocation7] sm:$0xff] }
  0x9d   :  { %1176 = vmatpush1.bf16.msra.mxu0 %v2771_v26  ;;  %1217 = vmatpush1.bf16.msra.mxu1 %v2773_v29  ;;  %v3123_v26 = vld [vmem:[#allocation8 + $0x18] sm:$0xff]   ;;  %v3126_v29 = vld [vmem:[#allocation8 + $0xd0] sm:$0xff]  }
  0x9e   :  { %1177 = vmatprep.subr.bf16.mxu0 %v2756_v30  ;;  %1218 = vmatprep.subr.bf16.mxu1 %v2758_v33  ;;  %v3127_v30 = vld [vmem:[#allocation8 + $0x10] sm:$0xff]   ;;  %v3130_v33 = vld [vmem:[#allocation8 + $0xc8] sm:$0xff]  }
  0xa1   :  { %1178 = vmatpush1.bf16.msra.mxu0 %v2755_v34  ;;  %1219 = vmatpush1.bf16.msra.mxu1 %v2757_v37  ;;  %v3131_v34 = vld [vmem:[#allocation8 + $0x8] sm:$0xff]   ;;  %v3134_v37 = vld [vmem:[#allocation8 + $0xc0] sm:$0xff]  }
  0xa2   :  { %1179 = vmatprep.subr.bf16.mxu0 %v2740_v38  ;;  %1220 = vmatprep.subr.bf16.mxu1 %v2742_v41  ;;  %v3135_v38 = vld [vmem:[#allocation8] sm:$0xff]   ;;  %v3138_v41 = vld [vmem:[#allocation8 + $0x1f8] sm:$0xff]  }
  0xa5   :  { %1180 = vmatpush1.bf16.msra.mxu0 %v2739_v42  ;;  %1221 = vmatpush1.bf16.msra.mxu1 %v2741_v43  ;;  %v207_v42 = vlaneseq }
  0xa6   :  { %1181 = vmatprep.subr.bf16.mxu0 %v2724_v44  ;;  %1222 = vmatprep.subr.bf16.mxu1 %v2726_v46 }
  0xa7   :  { %v3415_v43 = vshrl.u32 %v207_v42, 7 }
  0xa9   :  { %1182 = vmatpush1.bf16.msra.mxu0 %v2723_v49  ;;  %1223 = vmatpush1.bf16.msra.mxu1 %v2725_v51  ;;  %v209_v44 = vsub.s32 0, %v3415_v43  ;;  %v217_v0 = vsub.s32 2, %v3415_v43  ;;  %v213_v46 = vsub.s32 1, %v3415_v43  ;;  %v221_v47 = vsub.s32 3, %v3415_v43 }
  0xaa   :  { %1183 = vmatprep.subr.bf16.mxu0 %v2708_v52  ;;  %1224 = vmatprep.subr.bf16.mxu1 %v2710_v54 }
  0xab   :  { %v210_v48 = vrot.slane %v3418_v45, %v209_v44  ;;  %v218_v49 = vrot.slane %v3418_v45, %v217_v0  ;;  %v214_v50 = vrot.slane %v3418_v45, %v213_v46  ;;  %v222_v52 = vrot.slane %v3418_v45, %v221_v47 }
  0xad   :  { %1184 = vmatpush1.bf16.msra.mxu0 %v2707_v57  ;;  %1225 = vmatpush1.bf16.msra.mxu1 %v2709_v59 }
  0xae   :  { %1185 = vmatprep.subr.bf16.mxu0 %v2692_v60  ;;  %1226 = vmatprep.subr.bf16.mxu1 %v2694_v62 }
  0xb1   :  { %1186 = vmatpush1.bf16.msra.mxu0 %v2691_v2  ;;  %1227 = vmatpush1.bf16.msra.mxu1 %v2693_v3 }
  0xb2   :  { %1187 = vmatprep.subr.bf16.mxu0 %v2676_v4  ;;  %1228 = vmatprep.subr.bf16.mxu1 %v2678_v5 }
  0xb5   :  { %1188 = vmatpush1.bf16.msra.mxu0 %v2675_v6  ;;  %1229 = vmatpush1.bf16.msra.mxu1 %v2677_v8 }
  0xb6   :  { %2920 = vmatprep.subr.bf16.mxu0 %v3105_v7  ;;  %2942 = vmatprep.subr.bf16.mxu1 %v3106_v9  ;;  %v3139_v7 = vld [vmem:[#allocation8 + $0x138] sm:$0xff]  }
  0xb8   :  { %1206 = vmatmul.mubr.bf16.vlgmr.msra.gmra.mxu0 %v3399_v11  ;;  %1247 = vmatmul.mubr.bf16.vlgmr.msra.gmra.mxu1 %v3399_v11  ;;  %v3121_v11 = vld [vmem:[#allocation8 + $0x58] sm:$0xff]  }
  0xb9   :  { %2921 = vmatpush3.bf16.msra.mxu0 %v3107_v10  ;;  %2943 = vmatpush3.bf16.msra.mxu1 %v3108_v12  ;;  %v3140_v10 = vld [vmem:[#allocation8 + $0x1b8] sm:$0xff]   ;;  %v3141_v12 = vld [vmem:[#allocation8 + $0x170] sm:$0xff]  }
  0xba   :  { %2922 = vmatprep.subr.bf16.mxu0 %v3109_v13  ;;  %2944 = vmatprep.subr.bf16.mxu1 %v3110_v14  ;;  %v3142_v13 = vld [vmem:[#allocation8 + $0x1f0] sm:$0xff]  }
  0xbb   :  { %v3143_v14 = vld [vmem:[#allocation8 + $0x130] sm:$0xff]  }
  0xbd   :  { %2923 = vmatpush3.bf16.msra.mxu0 %v3111_v15  ;;  %2945 = vmatpush3.bf16.msra.mxu1 %v3112_v16  ;;  %v3144_v15 = vld [vmem:[#allocation8 + $0x1b0] sm:$0xff]   ;;  %v3145_v16 = vld [vmem:[#allocation8 + $0x168] sm:$0xff]  }
  0xbe   :  { %2924 = vmatprep.subr.bf16.mxu0 %v3113_v17  ;;  %2946 = vmatprep.subr.bf16.mxu1 %v3114_v18  ;;  %v3146_v17 = vld [vmem:[#allocation8 + $0x1e8] sm:$0xff]  }
  0xbf   :  { %v3147_v18 = vld [vmem:[#allocation8 + $0x128] sm:$0xff]  }
  0xc1   :  { %2925 = vmatpush3.bf16.msra.mxu0 %v3115_v19  ;;  %2947 = vmatpush3.bf16.msra.mxu1 %v3116_v20  ;;  %v3148_v19 = vld [vmem:[#allocation8 + $0x1a8] sm:$0xff]   ;;  %v3149_v20 = vld [vmem:[#allocation8 + $0x160] sm:$0xff]  }
  0xc2   :  { %2926 = vmatprep.subr.bf16.mxu0 %v3117_v21  ;;  %2948 = vmatprep.subr.bf16.mxu1 %v3118_v22  ;;  %v3150_v21 = vld [vmem:[#allocation8 + $0x1e0] sm:$0xff]  }
  0xc3   :  { %v3151_v22 = vld [vmem:[#allocation8 + $0x120] sm:$0xff]  }
  0xc5   :  { %2927 = vmatpush3.bf16.msra.mxu0 %v3119_v23  ;;  %2949 = vmatpush3.bf16.msra.mxu1 %v3120_v24  ;;  %v3152_v23 = vld [vmem:[#allocation8 + $0x1a0] sm:$0xff]   ;;  %v3153_v24 = vld [vmem:[#allocation8 + $0x158] sm:$0xff]  }
  0xc6   :  { %2928 = vmatprep.subr.bf16.mxu0 %v3121_v11  ;;  %2950 = vmatprep.subr.bf16.mxu1 %v3122_v25  ;;  %v3154_v11 = vld [vmem:[#allocation8 + $0x1d8] sm:$0xff]  }
  0xc7   :  { %v3155_v25 = vld [vmem:[#allocation8 + $0x118] sm:$0xff]  }
  0xc9   :  { %2929 = vmatpush3.bf16.msra.mxu0 %v3123_v26  ;;  %2951 = vmatpush3.bf16.msra.mxu1 %v3124_v27  ;;  %v3156_v26 = vld [vmem:[#allocation8 + $0x198] sm:$0xff]   ;;  %v3157_v27 = vld [vmem:[#allocation8 + $0x150] sm:$0xff]  }
  0xca   :  { %2930 = vmatprep.subr.bf16.mxu0 %v3125_v28  ;;  %2952 = vmatprep.subr.bf16.mxu1 %v3126_v29  ;;  %v3158_v28 = vld [vmem:[#allocation8 + $0x1d0] sm:$0xff]   ;;  %v225_v29 = vsub.s32 4, %v3415_v43 }
  0xcd   :  { %2931 = vmatpush3.bf16.msra.mxu0 %v3127_v30  ;;  %2953 = vmatpush3.bf16.msra.mxu1 %v3128_v31  ;;  %v233_v30 = vsub.s32 6, %v3415_v43  ;;  %v3159_v31 = vld [vmem:[#allocation8 + $0x110] sm:$0xff]  }
  0xce   :  { %2932 = vmatprep.subr.bf16.mxu0 %v3129_v32  ;;  %2954 = vmatprep.subr.bf16.mxu1 %v3130_v33  ;;  %v229_v32 = vsub.s32 5, %v3415_v43  ;;  %v3160_v33 = vld [vmem:[#allocation8 + $0x190] sm:$0xff]  }
  0xd1   :  { %2933 = vmatpush3.bf16.msra.mxu0 %v3131_v34  ;;  %2955 = vmatpush3.bf16.msra.mxu1 %v3132_v35  ;;  %v237_v34 = vsub.s32 7, %v3415_v43  ;;  %v3161_v35 = vld [vmem:[#allocation8 + $0x148] sm:$0xff]  }
  0xd2   :  { %2934 = vmatprep.subr.bf16.mxu0 %v3133_v36  ;;  %2956 = vmatprep.subr.bf16.mxu1 %v3134_v37  ;;  %v226_v36 = vrot.slane %v3418_v45, %v225_v29  ;;  %v3162_v37 = vld [vmem:[#allocation8 + $0x1c8] sm:$0xff]  }
  0xd3   :  { %v238_v42 = vrot.slane %v3418_v45, %v237_v34 }
  0xd5   :  { %2935 = vmatpush3.bf16.msra.mxu0 %v3135_v38  ;;  %2957 = vmatpush3.bf16.msra.mxu1 %v3136_v39  ;;  %v234_v38 = vrot.slane %v3418_v45, %v233_v30  ;;  %v230_v39 = vrot.slane %v3418_v45, %v229_v32  ;;  %v3168_v45 = vld [vmem:[#allocation8 + $0x180] sm:$0xff]  }
  0xd6   :  { %2964 = vmatprep.subr.bf16.mxu0 %v3137_v40  ;;  %2986 = vmatprep.subr.bf16.mxu1 %v3138_v41  ;;  %v3163_v40 = vld [vmem:[#allocation8 + $0x108] sm:$0xff]  }
 0x118   :  { %v961_v51 = vpop.f32.mrf.mxu0  ;;  %v1002_v54 = vpop.f32.mrf.mxu1 }
 0x119   :  { %v962_v53 = vadd.f32 %v961_v51, %v210_v48  ;;  %v1003_v55 = vadd.f32 %v1002_v54, %v218_v49  ;;  %v3164_v48 = vld [vmem:[#allocation8 + $0x188] sm:$0xff]   ;;  %v3165_v49 = vld [vmem:[#allocation8 + $0x140] sm:$0xff]  }
 0x11a   :  { %v963_v56 = vpop.f32.mrf.mxu0  ;;  %v1004_v58 = vpop.f32.mrf.mxu1 }
 0x11b   :  { %v964_v57 = vadd.f32 %v963_v56, %v214_v50  ;;  %v1255_v59 = vmax.f32 %v962_v53, 0.0  ;;  %v1257_v60 = vmax.f32 %v1003_v55, 0.0  ;;  %v1005_v61 = vadd.f32 %v1004_v58, %v222_v52  ;;  %v3166_v52 = vld [vmem:[#allocation8 + $0x1c0] sm:$0xff]  }
 0x11c   :  { %v965_v62 = vpop.f32.mrf.mxu0  ;;  %v1006_v1 = vpop.f32.mrf.mxu1 }
 0x11d   :  { %v1256_v63 = vmax.f32 %v964_v57, 0.0  ;;  %v1258_v2 = vmax.f32 %v1005_v61, 0.0  ;;  %v1273_v4 = vpack.c.bf16 %v1257_v60, %v1257_v60  ;;  %v1271_v8 = vpack.c.bf16 %v1255_v59, %v1255_v59  ;;  %v3167_v57 = vld [vmem:[#allocation8 + $0x100] sm:$0xff]   ;;  %v3169_v62 = vld [vmem:[#allocation8 + $0x278] sm:$0xff]  }
 0x11e   :  { %v966_v3 = vpop.f32.mrf.mxu0  ;;  %v1007_v6 = vpop.f32.mrf.mxu1 }
 0x11f   :  { %v1272_v5 = vpack.c.bf16 %v1256_v63, %v1256_v63  ;;  %v1274_v9 = vpack.c.bf16 %v1258_v2, %v1258_v2  ;;  %v3170_v2 = vld [vmem:[#allocation8 + $0x2f8] sm:$0xff]  }
 0x121   :  { %2350 = vmatprep.mubr.bf16.mxu0 %v1272_v5  ;;  %2390 = vmatprep.mubr.bf16.mxu1 %v1274_v9 }
 0x122   :  { %2351 = vmatmul.mubr.bf16.vlgmr.msra.gmra.mxu0 %v1271_v8  ;;  %2391 = vmatmul.mubr.bf16.vlgmr.msra.gmra.mxu1 %v1273_v4  ;;  %v3171_v8 = vld [vmem:[#allocation8 + $0x238] sm:$0xff]  }
 0x123   :  { %2965 = vmatpush3.bf16.msra.mxu0 %v3139_v7  ;;  %2987 = vmatpush3.bf16.msra.mxu1 %v3140_v10 }
 0x124   :  { %2966 = vmatprep.subr.bf16.mxu0 %v3141_v12  ;;  %2988 = vmatprep.subr.bf16.mxu1 %v3142_v13  ;;  %v3172_v12 = vld [vmem:[#allocation8 + $0x2b8] sm:$0xff]   ;;  %v3173_v13 = vld [vmem:[#allocation8 + $0x270] sm:$0xff]  }
 0x127   :  { %2967 = vmatpush3.bf16.msra.mxu0 %v3143_v14  ;;  %2989 = vmatpush3.bf16.msra.mxu1 %v3144_v15  ;;  %v3174_v14 = vld [vmem:[#allocation8 + $0x2f0] sm:$0xff]  }
 0x128   :  { %2968 = vmatprep.subr.bf16.mxu0 %v3145_v16  ;;  %2990 = vmatprep.subr.bf16.mxu1 %v3146_v17  ;;  %v3175_v15 = vld [vmem:[#allocation8 + $0x230] sm:$0xff]   ;;  %v3177_v17 = vld [vmem:[#allocation8 + $0x268] sm:$0xff]  }
 0x129   :  { %v3176_v16 = vld [vmem:[#allocation8 + $0x2b0] sm:$0xff]  }
 0x12b   :  { %2969 = vmatpush3.bf16.msra.mxu0 %v3147_v18  ;;  %2991 = vmatpush3.bf16.msra.mxu1 %v3148_v19  ;;  %v3178_v18 = vld [vmem:[#allocation8 + $0x2e8] sm:$0xff]  }
 0x12c   :  { %2970 = vmatprep.subr.bf16.mxu0 %v3149_v20  ;;  %2992 = vmatprep.subr.bf16.mxu1 %v3150_v21  ;;  %v3179_v19 = vld [vmem:[#allocation8 + $0x228] sm:$0xff]   ;;  %v3181_v21 = vld [vmem:[#allocation8 + $0x260] sm:$0xff]  }
 0x12d   :  { %v3180_v20 = vld [vmem:[#allocation8 + $0x2a8] sm:$0xff]  }
 0x12f   :  { %2971 = vmatpush3.bf16.msra.mxu0 %v3151_v22  ;;  %2993 = vmatpush3.bf16.msra.mxu1 %v3152_v23  ;;  %v3182_v22 = vld [vmem:[#allocation8 + $0x2e0] sm:$0xff]  }
 0x130   :  { %2972 = vmatprep.subr.bf16.mxu0 %v3153_v24  ;;  %2994 = vmatprep.subr.bf16.mxu1 %v3154_v11  ;;  %v3183_v23 = vld [vmem:[#allocation8 + $0x220] sm:$0xff]   ;;  %v3185_v11 = vld [vmem:[#allocation8 + $0x258] sm:$0xff]  }
 0x131   :  { %v3184_v24 = vld [vmem:[#allocation8 + $0x2a0] sm:$0xff]  }
 0x133   :  { %2973 = vmatpush3.bf16.msra.mxu0 %v3155_v25  ;;  %2995 = vmatpush3.bf16.msra.mxu1 %v3156_v26  ;;  %v3186_v25 = vld [vmem:[#allocation8 + $0x2d8] sm:$0xff]  }
 0x134   :  { %2974 = vmatprep.subr.bf16.mxu0 %v3157_v27  ;;  %2996 = vmatprep.subr.bf16.mxu1 %v3158_v28  ;;  %v3187_v26 = vld [vmem:[#allocation8 + $0x218] sm:$0xff]   ;;  %v3189_v28 = vld [vmem:[#allocation8 + $0x250] sm:$0xff]  }
 0x135   :  { %v3188_v27 = vld [vmem:[#allocation8 + $0x298] sm:$0xff]  }
 0x137   :  { %2975 = vmatpush3.bf16.msra.mxu0 %v3159_v31  ;;  %2997 = vmatpush3.bf16.msra.mxu1 %v3160_v33  ;;  %v3190_v31 = vld [vmem:[#allocation8 + $0x2d0] sm:$0xff]   ;;  %v3451_v33 = vld [vmem:[#allocation7 + $0x8] sm:$0xff] }
 0x138   :  { %v1043_v41 = vpop.f32.mrf.mxu0  ;;  %2976 = vmatprep.subr.bf16.mxu0 %v3161_v35  ;;  %v1084_v51 = vpop.f32.mrf.mxu1  ;;  %2998 = vmatprep.subr.bf16.mxu1 %v3162_v37  ;;  %v3191_v35 = vld [vmem:[#allocation8 + $0x210] sm:$0xff]   ;;  %v3193_v37 = vld [vmem:[#allocation8 + $0x248] sm:$0xff]  }
 0x139   :  { %v1044_v50 = vadd.f32 %v1043_v41, %v226_v36  ;;  %v1085_v53 = vadd.f32 %v1084_v51, %v234_v38  ;;  %v3192_v36 = vld [vmem:[#allocation8 + $0x290] sm:$0xff]   ;;  %v242_v38 = vrot.slane %v3451_v33, %v209_v44  ;;  %v246_v41 = vrot.slane %v3451_v33, %v213_v46  ;;  %v3197_v44 = vld [vmem:[#allocation8 + $0x240] sm:$0xff]  }
 0x13a   :  { %v1045_v54 = vpop.f32.mrf.mxu0  ;;  %v1086_v56 = vpop.f32.mrf.mxu1  ;;  %v3199_v46 = vld [vmem:[#allocation8 + $0x200] sm:$0xff]  }
 0x13b   :  { %v1046_v55 = vadd.f32 %v1045_v54, %v230_v39  ;;  %2977 = vmatpush3.bf16.msra.mxu0 %v3163_v40  ;;  %v1259_v58 = vmax.f32 %v1044_v50, 0.0  ;;  %v1261_v59 = vmax.f32 %v1085_v53, 0.0  ;;  %v1087_v60 = vadd.f32 %v1086_v56, %v238_v42  ;;  %2999 = vmatpush3.bf16.msra.mxu1 %v3164_v48  ;;  %v3194_v39 = vld [vmem:[#allocation8 + $0x2c8] sm:$0xff]   ;;  %v3198_v53 = vld [vmem:[#allocation8 + $0x2c0] sm:$0xff]  }
 0x13c   :  { %v1047_v61 = vpop.f32.mrf.mxu0  ;;  %2978 = vmatprep.subr.bf16.mxu0 %v3165_v49  ;;  %v1088_v1 = vpop.f32.mrf.mxu1  ;;  %3000 = vmatprep.subr.bf16.mxu1 %v3166_v52  ;;  %v250_v40 = vrot.slane %v3451_v33, %v217_v0  ;;  %v3195_v42 = vld [vmem:[#allocation8 + $0x208] sm:$0xff]   ;;  %v254_v49 = vrot.slane %v3451_v33, %v221_v47  ;;  %v3200_v47 = vld [vmem:[#allocation8 + $0x280] sm:$0xff]  }
 0x13d   :  { %v1260_v63 = vmax.f32 %v1046_v55, 0.0  ;;  %v1262_v3 = vmax.f32 %v1087_v60, 0.0  ;;  %v1277_v5 = vpack.c.bf16 %v1261_v59, %v1261_v59  ;;  %v1275_v9 = vpack.c.bf16 %v1259_v58, %v1259_v58  ;;  %v3196_v50 = vld [vmem:[#allocation8 + $0x288] sm:$0xff]   ;;  %v3201_v61 = vld [vmem:[#allocation8 + $0x378] sm:$0xff]  }
 0x13e   :  { %v1048_v4 = vpop.f32.mrf.mxu0  ;;  %v1089_v7 = vpop.f32.mrf.mxu1 }
 0x13f   :  { %v1276_v6 = vpack.c.bf16 %v1260_v63, %v1260_v63  ;;  %2979 = vmatpush3.bf16.msra.mxu0 %v3167_v57  ;;  %v1278_v10 = vpack.c.bf16 %v1262_v3, %v1262_v3  ;;  %3001 = vmatpush3.bf16.msra.mxu1 %v3168_v45  ;;  %v3202_v63 = vld [vmem:[#allocation8 + $0x3f8] sm:$0xff]  }
 0x140   :  { %3008 = vmatprep.subr.bf16.mxu0 %v3169_v62  ;;  %3030 = vmatprep.subr.bf16.mxu1 %v3170_v2 }
 0x141   :  { %2430 = vmatprep.mubr.bf16.mxu0 %v1276_v6  ;;  %2470 = vmatprep.mubr.bf16.mxu1 %v1278_v10  ;;  %v3203_v6 = vld [vmem:[#allocation8 + $0x338] sm:$0xff]   ;;  %v3205_v10 = vld [vmem:[#allocation8 + $0x370] sm:$0xff]  }
 0x142   :  { %2431 = vmatmul.mubr.bf16.vlgmr.msra.gmra.mxu0 %v1275_v9  ;;  %2471 = vmatmul.mubr.bf16.vlgmr.msra.gmra.mxu1 %v1277_v5  ;;  %v3204_v9 = vld [vmem:[#allocation8 + $0x3b8] sm:$0xff]  }
 0x143   :  { %3009 = vmatpush3.bf16.msra.mxu0 %v3171_v8  ;;  %3031 = vmatpush3.bf16.msra.mxu1 %v3172_v12  ;;  %v3206_v12 = vld [vmem:[#allocation8 + $0x3f0] sm:$0xff]  }
 0x144   :  { %3010 = vmatprep.subr.bf16.mxu0 %v3173_v13  ;;  %3032 = vmatprep.subr.bf16.mxu1 %v3174_v14  ;;  %v3207_v13 = vld [vmem:[#allocation8 + $0x330] sm:$0xff]  }
 0x145   :  { %v3208_v14 = vld [vmem:[#allocation8 + $0x3b0] sm:$0xff]  }
 0x147   :  { %3011 = vmatpush3.bf16.msra.mxu0 %v3175_v15  ;;  %3033 = vmatpush3.bf16.msra.mxu1 %v3176_v16  ;;  %v3209_v15 = vld [vmem:[#allocation8 + $0x368] sm:$0xff]  }
 0x148   :  { %3012 = vmatprep.subr.bf16.mxu0 %v3177_v17  ;;  %3034 = vmatprep.subr.bf16.mxu1 %v3178_v18  ;;  %v3210_v16 = vld [vmem:[#allocation8 + $0x3e8] sm:$0xff]  }
 0x149   :  { %v3211_v17 = vld [vmem:[#allocation8 + $0x328] sm:$0xff]  }
 0x14a   :  { %v3212_v18 = vld [vmem:[#allocation8 + $0x3a8] sm:$0xff]  }
 0x14b   :  { %3013 = vmatpush3.bf16.msra.mxu0 %v3179_v19  ;;  %3035 = vmatpush3.bf16.msra.mxu1 %v3180_v20  ;;  %v3213_v19 = vld [vmem:[#allocation8 + $0x360] sm:$0xff]  }
 0x14c   :  { %3014 = vmatprep.subr.bf16.mxu0 %v3181_v21  ;;  %3036 = vmatprep.subr.bf16.mxu1 %v3182_v22  ;;  %v3214_v20 = vld [vmem:[#allocation8 + $0x3e0] sm:$0xff]  }
 0x14d   :  { %v3215_v21 = vld [vmem:[#allocation8 + $0x320] sm:$0xff]  }
 0x14e   :  { %v3216_v22 = vld [vmem:[#allocation8 + $0x3a0] sm:$0xff]  }
 0x14f   :  { %3015 = vmatpush3.bf16.msra.mxu0 %v3183_v23  ;;  %3037 = vmatpush3.bf16.msra.mxu1 %v3184_v24  ;;  %v3217_v23 = vld [vmem:[#allocation8 + $0x358] sm:$0xff]  }
 0x150   :  { %3016 = vmatprep.subr.bf16.mxu0 %v3185_v11  ;;  %3038 = vmatprep.subr.bf16.mxu1 %v3186_v25  ;;  %v3218_v24 = vld [vmem:[#allocation8 + $0x3d8] sm:$0xff]  }
 0x151   :  { %v3219_v11 = vld [vmem:[#allocation8 + $0x318] sm:$0xff]  }
 0x152   :  { %v3220_v25 = vld [vmem:[#allocation8 + $0x398] sm:$0xff]  }
 0x153   :  { %3017 = vmatpush3.bf16.msra.mxu0 %v3187_v26  ;;  %3039 = vmatpush3.bf16.msra.mxu1 %v3188_v27  ;;  %v3221_v26 = vld [vmem:[#allocation8 + $0x350] sm:$0xff]  }
 0x154   :  { %3018 = vmatprep.subr.bf16.mxu0 %v3189_v28  ;;  %3040 = vmatprep.subr.bf16.mxu1 %v3190_v31  ;;  %v3222_v27 = vld [vmem:[#allocation8 + $0x3d0] sm:$0xff]  }
 0x155   :  { %v3223_v28 = vld [vmem:[#allocation8 + $0x310] sm:$0xff]  }
 0x156   :  { %v3224_v31 = vld [vmem:[#allocation8 + $0x390] sm:$0xff]  }
 0x157   :  { %3019 = vmatpush3.bf16.msra.mxu0 %v3191_v35  ;;  %3041 = vmatpush3.bf16.msra.mxu1 %v3192_v36  ;;  %v3225_v35 = vld [vmem:[#allocation8 + $0x348] sm:$0xff]   ;;  %v258_v36 = vrot.slane %v3451_v33, %v225_v29  ;;  %v3229_v29 = vld [vmem:[#allocation8 + $0x340] sm:$0xff]  }
 0x158   :  { %v1125_v48 = vpop.f32.mrf.mxu0  ;;  %3020 = vmatprep.subr.bf16.mxu0 %v3193_v37  ;;  %v1166_v52 = vpop.f32.mrf.mxu1  ;;  %3042 = vmatprep.subr.bf16.mxu1 %v3194_v39  ;;  %v3226_v37 = vld [vmem:[#allocation8 + $0x3c8] sm:$0xff]   ;;  %v262_v39 = vrot.slane %v3451_v33, %v229_v32  ;;  %v3231_v32 = vld [vmem:[#allocation8 + $0x300] sm:$0xff]  }
 0x159   :  { %v1126_v51 = vadd.f32 %v1125_v48, %v242_v38  ;;  %v1167_v0 = vadd.f32 %v1166_v52, %v250_v40  ;;  %v266_v38 = vrot.slane %v3451_v33, %v233_v30  ;;  %v3227_v40 = vld [vmem:[#allocation8 + $0x308] sm:$0xff]  }
 0x15a   :  { %v1127_v54 = vpop.f32.mrf.mxu0  ;;  %v1168_v56 = vpop.f32.mrf.mxu1  ;;  %v3228_v48 = vld [vmem:[#allocation8 + $0x388] sm:$0xff]  }
 0x15b   :  { %v1128_v55 = vadd.f32 %v1127_v54, %v246_v41  ;;  %3021 = vmatpush3.bf16.msra.mxu0 %v3195_v42  ;;  %v1263_v57 = vmax.f32 %v1126_v51, 0.0  ;;  %v1265_v58 = vmax.f32 %v1167_v0, 0.0  ;;  %v1169_v59 = vadd.f32 %v1168_v56, %v254_v49  ;;  %3043 = vmatpush3.bf16.msra.mxu1 %v3196_v50 }
 0x15c   :  { %v1129_v60 = vpop.f32.mrf.mxu0  ;;  %3022 = vmatprep.subr.bf16.mxu0 %v3197_v44  ;;  %v1170_v62 = vpop.f32.mrf.mxu1  ;;  %3044 = vmatprep.subr.bf16.mxu1 %v3198_v53  ;;  %v270_v42 = vrot.slane %v3451_v33, %v237_v34  ;;  %v3230_v44 = vld [vmem:[#allocation8 + $0x3c0] sm:$0xff]  }
 0x15d   :  { %v1264_v45 = vmax.f32 %v1128_v55, 0.0  ;;  %v1266_v1 = vmax.f32 %v1169_v59, 0.0  ;;  %v1281_v3 = vpack.c.bf16 %v1265_v58, %v1265_v58  ;;  %v1279_v7 = vpack.c.bf16 %v1263_v57, %v1263_v57  ;;  %v3232_v34 = vld [vmem:[#allocation8 + $0x380] sm:$0xff]  }
 0x15e   :  { %v1130_v2 = vpop.f32.mrf.mxu0  ;;  %v1171_v5 = vpop.f32.mrf.mxu1 }
 0x15f   :  { %v1280_v4 = vpack.c.bf16 %v1264_v45, %v1264_v45  ;;  %3023 = vmatpush3.bf16.msra.mxu0 %v3199_v46  ;;  %v1282_v8 = vpack.c.bf16 %v1266_v1, %v1266_v1  ;;  %3045 = vmatpush3.bf16.msra.mxu1 %v3200_v47 }
 0x160   :  { %3052 = vmatprep.subr.bf16.mxu0 %v3201_v61  ;;  %3074 = vmatprep.subr.bf16.mxu1 %v3202_v63  ;;  %v2791_v63 = vld [vmem:[%s3487_s4] ss:$0 sm:$0xff]  ;;  %s3351_s4 = smov [#allocation10]  }
 0x161   :  { %2510 = vmatprep.mubr.bf16.mxu0 %v1280_v4  ;;  %2550 = vmatprep.mubr.bf16.mxu1 %v1282_v8  ;;  %s2652_s14 = sshll.u32 %s3351_s4, 4  ;;  %s2653_s14 = int_to_ptr.vmem [resolvable:$true] %s2652_s14 }
 0x162   :  { %2511 = vmatmul.mubr.bf16.vlgmr.msra.gmra.mxu0 %v1279_v7  ;;  %2551 = vmatmul.mubr.bf16.vlgmr.msra.gmra.mxu1 %v1281_v3  ;;  %s3315_s15 = scalar_lea.vmem %s2653_s14, 128  ;;  %p3320_p7 = scmp.lt.s32.totalorder %s2653_s14, %s2653_s14 }
 0x163   :  { %3053 = vmatpush3.bf16.msra.mxu0 %v3203_v6  ;;  %3075 = vmatpush3.bf16.msra.mxu1 %v3204_v9  ;;  %p3316_p6 = scmp.ne.s32.totalorder %s2653_s14, %s3315_s15  ;;  %p3321_p8 = scmp.lt.s32.totalorder %s3315_s15, %s3315_s15 }
 0x164   :  { %3054 = vmatprep.subr.bf16.mxu0 %v3205_v10  ;;  %3076 = vmatprep.subr.bf16.mxu1 %v3206_v12 }
 0x165   :  { %p3322_p9 = por %p3321_p8, %p3320_p7 }
 0x167   :  { %3055 = vmatpush3.bf16.msra.mxu0 %v3207_v13  ;;  %3077 = vmatpush3.bf16.msra.mxu1 %v3208_v14  ;;  %p3323_p10 = pnand %p3322_p9, %p3316_p6 }
 0x168   :  { %3056 = vmatprep.subr.bf16.mxu0 %v3209_v15  ;;  %3078 = vmatprep.subr.bf16.mxu1 %v3210_v16 }
 0x16b   :  { %3057 = vmatpush3.bf16.msra.mxu0 %v3211_v17  ;;  %3079 = vmatpush3.bf16.msra.mxu1 %v3212_v18 }
 0x16c   :  { %3058 = vmatprep.subr.bf16.mxu0 %v3213_v19  ;;  %3080 = vmatprep.subr.bf16.mxu1 %v3214_v20 }
 0x16f   :  { %3059 = vmatpush3.bf16.msra.mxu0 %v3215_v21  ;;  %3081 = vmatpush3.bf16.msra.mxu1 %v3216_v22 }
 0x170   :  { %3060 = vmatprep.subr.bf16.mxu0 %v3217_v23  ;;  %3082 = vmatprep.subr.bf16.mxu1 %v3218_v24 }
 0x173   :  { %3061 = vmatpush3.bf16.msra.mxu0 %v3219_v11  ;;  %3083 = vmatpush3.bf16.msra.mxu1 %v3220_v25 }
 0x174   :  { %3062 = vmatprep.subr.bf16.mxu0 %v3221_v26  ;;  %3084 = vmatprep.subr.bf16.mxu1 %v3222_v27 }
 0x177   :  { %3063 = vmatpush3.bf16.msra.mxu0 %v3223_v28  ;;  %3085 = vmatpush3.bf16.msra.mxu1 %v3224_v31 }
 0x178   :  { %v1207_v41 = vpop.f32.mrf.mxu0  ;;  %3064 = vmatprep.subr.bf16.mxu0 %v3225_v35  ;;  %v1248_v50 = vpop.f32.mrf.mxu1  ;;  %3086 = vmatprep.subr.bf16.mxu1 %v3226_v37 }
 0x179   :  { %v1208_v49 = vadd.f32 %v1207_v41, %v258_v36  ;;  %v1249_v30 = vadd.f32 %v1248_v50, %v266_v38 }
 0x17a   :  { %v1209_v51 = vpop.f32.mrf.mxu0  ;;  %v1250_v53 = vpop.f32.mrf.mxu1 }
 0x17b   :  { %v1210_v52 = vadd.f32 %v1209_v51, %v262_v39  ;;  %3065 = vmatpush3.bf16.msra.mxu0 %v3227_v40  ;;  %v1267_v0 = vmax.f32 %v1208_v49, 0.0  ;;  %v1269_v54 = vmax.f32 %v1249_v30, 0.0  ;;  %v1251_v55 = vadd.f32 %v1250_v53, %v270_v42  ;;  %3087 = vmatpush3.bf16.msra.mxu1 %v3228_v48 }
 0x17c   :  { %v1211_v43 = vpop.f32.mrf.mxu0  ;;  %3066 = vmatprep.subr.bf16.mxu0 %v3229_v29  ;;  %v1252_v56 = vpop.f32.mrf.mxu1  ;;  %3088 = vmatprep.subr.bf16.mxu1 %v3230_v44 }
 0x17d   :  { %v1268_v33 = vmax.f32 %v1210_v52, 0.0  ;;  %v1270_v46 = vmax.f32 %v1251_v55, 0.0  ;;  %v1285_v58 = vpack.c.bf16 %v1269_v54, %v1269_v54  ;;  %v1283_v47 = vpack.c.bf16 %v1267_v0, %v1267_v0 }
 0x17e   :  { %v1212_v57 = vpop.f32.mrf.mxu0  ;;  %v1253_v60 = vpop.f32.mrf.mxu1 }
 0x17f   :  { %v1284_v59 = vpack.c.bf16 %v1268_v33, %v1268_v33  ;;  %3067 = vmatpush3.bf16.msra.mxu0 %v3231_v32  ;;  %v1286_v61 = vpack.c.bf16 %v1270_v46, %v1270_v46  ;;  %3089 = vmatpush3.bf16.msra.mxu1 %v3232_v34 }
 0x181   :  { %2590 = vmatprep.mubr.bf16.mxu0 %v1284_v59  ;;  %2630 = vmatprep.mubr.bf16.mxu1 %v1286_v61 }
 0x182   :  { %2591 = vmatmul.mubr.bf16.vlgmr.msra.gmra.mxu0 %v1283_v47  ;;  %2631 = vmatmul.mubr.bf16.vlgmr.msra.gmra.mxu1 %v1285_v58 }
 0x1e2   :  { %v2936_v45 = vpop.f32.mrf.mxu0  ;;  %v2958_v62 = vpop.f32.mrf.mxu1 }
 0x1e4   :  { %v2937_v1 = vpop.f32.mrf.mxu0  ;;  %v2959_v3 = vpop.f32.mrf.mxu1 }
 0x1e5   :  { %v2938_v2 = vadd.f32 %v2937_v1, %v2936_v45  ;;  %v2960_v4 = vadd.f32 %v2959_v3, %v2958_v62 }
 0x1e6   :  { %v2939_v5 = vpop.f32.mrf.mxu0  ;;  %v2961_v7 = vpop.f32.mrf.mxu1 }
 0x1e7   :  { %v2353_v6 = vadd.f32 %v2938_v2, %v2791_v63 }
 0x1e8   :  { %v2940_v8 = vpop.f32.mrf.mxu0  ;;  %v2962_v10 = vpop.f32.mrf.mxu1 }
 0x1e9   :  { %v2393_v9 = vadd.f32 %v2960_v4, %v2353_v6 }
 0x202   :  { %v2980_v12 = vpop.f32.mrf.mxu0  ;;  %v3002_v13 = vpop.f32.mrf.mxu1 }
 0x204   :  { %v2981_v14 = vpop.f32.mrf.mxu0  ;;  %v3003_v15 = vpop.f32.mrf.mxu1 }
 0x205   :  { %v2982_v27 = vadd.f32 %v2981_v14, %v2980_v12  ;;  %v3004_v31 = vadd.f32 %v3003_v15, %v3002_v13 }
 0x206   :  { %v2983_v16 = vpop.f32.mrf.mxu0  ;;  %v3005_v17 = vpop.f32.mrf.mxu1 }
 0x207   :  { %v2433_v28 = vadd.f32 %v2982_v27, %v2393_v9 }
 0x208   :  { %v2984_v18 = vpop.f32.mrf.mxu0  ;;  %v3006_v19 = vpop.f32.mrf.mxu1 }
 0x209   :  { %v2473_v36 = vadd.f32 %v3004_v31, %v2433_v28 }
 0x222   :  { %v3024_v20 = vpop.f32.mrf.mxu0  ;;  %v3046_v21 = vpop.f32.mrf.mxu1 }
 0x224   :  { %v3025_v22 = vpop.f32.mrf.mxu0  ;;  %v3047_v23 = vpop.f32.mrf.mxu1 }
 0x225   :  { %v3026_v35 = vadd.f32 %v3025_v22, %v3024_v20  ;;  %v3048_v39 = vadd.f32 %v3047_v23, %v3046_v21 }
 0x226   :  { %v3027_v24 = vpop.f32.mrf.mxu0  ;;  %v3049_v11 = vpop.f32.mrf.mxu1 }
 0x227   :  { %v2513_v37 = vadd.f32 %v3026_v35, %v2473_v36 }
 0x228   :  { %v3028_v25 = vpop.f32.mrf.mxu0  ;;  %v3050_v26 = vpop.f32.mrf.mxu1 }
 0x229   :  { %v2553_v42 = vadd.f32 %v3048_v39, %v2513_v37 }
 0x242   :  { %v3068_v38 = vpop.f32.mrf.mxu0  ;;  %v3090_v40 = vpop.f32.mrf.mxu1 }
 0x244   :  { %v3069_v41 = vpop.f32.mrf.mxu0  ;;  %v3091_v29 = vpop.f32.mrf.mxu1 }
 0x245   :  { %v3070_v48 = vadd.f32 %v3069_v41, %v3068_v38  ;;  %v3092_v44 = vadd.f32 %v3091_v29, %v3090_v40 }
 0x246   :  { %v3071_v49 = vpop.f32.mrf.mxu0  ;;  %v3093_v30 = vpop.f32.mrf.mxu1 }
 0x247   :  { %v2593_v50 = vadd.f32 %v3070_v48, %v2553_v42 }
 0x248   :  { %v3072_v51 = vpop.f32.mrf.mxu0  ;;  %v3094_v52 = vpop.f32.mrf.mxu1 }
 0x249   :  { %v2633_v53 = vadd.f32 %v3092_v44, %v2593_v50 }
 0x24b   :  { %v2638_v32 = vmul.f32 %v2633_v53, %v2633_v53 }
 0x24d   :  { %2639 = vadd.xlane.f32.xlu0 %v2638_v32 }
 0x2d6   :  { %v2640_v0 = vpop.xlane.xlu0 %2639 }
 0x2d7   :  { %3233 = vrsqrt.f32 %v2640_v0  ;;  %vm2641_vm0 = vcmp.eq.f32.partialorder %v2640_v0, 0.0 }
 0x2e4   :  { %v3234_v54 = vpop.eup %3233 }
 0x2e5   :  { %v2643_v55 = vsel %vm2641_vm0, 1.0, %v3234_v54 }
 0x2e6   :  { %v2644_v43 = vmul.f32 %v2643_v55, %v2633_v53 }
 0x2e8   :  { %2645 = vst [vmem:[#allocation10] sm:$0xff] %v2644_v43 }
 0x2e9   :  { %3326 = shalt.err (!%p3323_p10)
}
 0x2ea   :  { %2655 = dma.vmem_to_hbm [thread:$0]  %s2653_s14, 128, %s3488_s5, [#allocation4]  }
 0x2eb   :  { %3341 = dma.done.wait [#allocation4], 128  }
 0x2ec   :  { %3342 = vsyncadd [#allocation4], 4294967168 }
 0x2ed   :  { %2659 = vsyncpa [#allocation3], 1 }
 0x2ee   :  { %2660 = vsyncpa [#allocation6], 1 }
 0x2ef   :  { %2661 = vsyncpa [#allocation9], 1 }
 0x2f0   :  { %2662 = vsyncpa [#allocation4], 1 }

</bundles_post_ra>
